<compile_context>
chip_gen: v6e
topology: v6e:2x2x1
jax: 0.10.0
libtpu: 0.0.40
codegen_flags: <defaults>
</compile_context>

<pallas_src>
import functools

import jax
import jax.numpy as jnp
from jax import lax
from jax.experimental import pallas as pl
from jax.experimental.pallas import tpu as pltpu

LANE = 128   # vreg lane width
SUB = 8      # vreg sublane height
GB = 128     # packed gate-block width (3*H and 3*L both fit in one block)


def _round_up(n, m):
    return ((n + m - 1) // m) * m


def _pad2(a, rows, cols):
    return jnp.pad(a, ((0, rows - a.shape[0]), (0, cols - a.shape[1])))


# ----------------------------------------------------------------------------
# GRU recurrence step (PyTorch semantics, gate order [r, z, n]).
# gi = x_t @ W_ih + b_ih is precomputed outside the loop; gates are packed in
# one 128-lane block at lane offsets [0:hid | hid:2hid | 2hid:3hid].
# ----------------------------------------------------------------------------
def _gru_step(gi, w_hh, b_hh, h, hid):
    gh = jnp.dot(h, w_hh, preferred_element_type=jnp.float32) + b_hh  # (Bp,GB)
    r = jax.nn.sigmoid(gi[:, 0:hid] + gh[:, 0:hid])
    z = jax.nn.sigmoid(gi[:, hid:2 * hid] + gh[:, hid:2 * hid])
    n = jnp.tanh(gi[:, 2 * hid:3 * hid] + r * gh[:, 2 * hid:3 * hid])
    return (1.0 - z) * n + z * h


# ----------------------------------------------------------------------------
# Pallas kernel: encoder GRU -> mu/logvar -> decoder GRU -> loss + molecule_emb
# ----------------------------------------------------------------------------
def vae_kernel(x_ref, mask_ref, w_ih_ref, w_enc_ref, w_dec_ref, bias_ref,
               loss_ref, emb_ref, gi_ref, hstash_ref,
               *, T, Bp, H, L, b_true, d_true, beta, batch_size_const):
    # ---- fused input-to-hidden projection for encoder AND decoder ----------
    # x rows: block 0 = SOS, block t (1..T) = smile[t-1] (time-major).
    # gi lanes: 0:GB encoder gates, GB:2GB decoder gates.
    gi_ref[...] = (jnp.dot(x_ref[...], w_ih_ref[...],
                           preferred_element_type=jnp.float32)
                   + bias_ref[:, 0:2 * GB])

    # ---- encoder recurrence (only h-dependent work on the serial chain) ----
    w_hh_e = w_enc_ref[:, 0:GB]                    # (H, GB)
    b_hh_e = bias_ref[:, 2 * GB:3 * GB]
    h = jnp.zeros((Bp, H), jnp.float32)
    for t in range(T):
        gi_t = gi_ref[(t + 1) * Bp:(t + 2) * Bp, 0:GB]
        h = _gru_step(gi_t, w_hh_e, b_hh_e, h, H)
    h_enc = h                                      # (Bp, H)

    # ---- fused mu / logvar head (single block: mu 0:L, logvar L:2L) --------
    mulv = (jnp.dot(h_enc, w_enc_ref[:, GB:2 * GB],
                    preferred_element_type=jnp.float32)
            + bias_ref[:, 4 * GB:5 * GB])          # (Bp, GB)
    mu = mulv[:, 0:L]
    logvar = mulv[:, L:2 * L]
    z_lat = mu                   # reparameterize_with_noise == False => z = mu

    # ---- decoder recurrence (teacher forcing; SOS is gi row-block 0) -------
    w_hh_d = w_dec_ref[:, 0:GB]                    # (L, GB)
    b_hh_d = bias_ref[:, 3 * GB:4 * GB]
    h_d = z_lat
    for t in range(T):
        gi_t = gi_ref[t * Bp:(t + 1) * Bp, GB:2 * GB]
        h_d = _gru_step(gi_t, w_hh_d, b_hh_d, h_d, L)
        hstash_ref[t * Bp:(t + 1) * Bp, :] = h_d   # stash for hoisted readout

    # ---- hoisted readout + masked MSE (reduce lanes first, then mask) ------
    y = (jnp.dot(hstash_ref[...], w_dec_ref[:, GB:2 * GB],
                 preferred_element_type=jnp.float32)
         + bias_ref[:, 5 * GB:6 * GB])             # (T*Bp, Dp)
    diff = x_ref[Bp:, :] - y                       # padded lanes are exactly 0
    row_sq = jnp.sum(diff * diff, axis=-1, keepdims=True)   # (T*Bp, 1)
    mask = mask_ref[...]                                      # (T*Bp, 1)
    recon = jnp.sum(row_sq * mask) * (1.0 / float(T * b_true * d_true))

    # ---- KLD (mu/logvar slices carry no padded lanes) ----------------------
    bmask = mask_ref[0:Bp, :]                      # (Bp, 1) batch-row mask
    kld_terms = (1.0 + logvar - mu * mu - jnp.exp(logvar)) * bmask
    kld = 0.5 * jnp.sum(kld_terms) * (1.0 / float(b_true * L))

    loss_ref[0, 0] = (0.1 * jnp.float32(batch_size_const)
                      * (recon - jnp.float32(beta) * kld))
    emb_ref[...] = h_enc


# ----------------------------------------------------------------------------
# Parameter construction (deterministic, in-script; PyTorch layouts)
# ----------------------------------------------------------------------------
def init_params(key, input_dim, hidden_size, latent_size):
    D, H, L = input_dim, hidden_size, latent_size
    ks = jax.random.split(key, 16)

    def u(k, shape, scale):
        return jax.random.uniform(k, shape, jnp.float32, -scale, scale)

    sh, sl = 1.0 / jnp.sqrt(H), 1.0 / jnp.sqrt(L)
    return dict(
        sos=jax.random.normal(ks[0], (1, D), jnp.float32),   # nn.Embedding(1, D)
        # encoder GRU
        w_ih_e=u(ks[1], (3 * H, D), sh), w_hh_e=u(ks[2], (3 * H, H), sh),
        b_ih_e=u(ks[3], (1, 3 * H), sh), b_hh_e=u(ks[4], (1, 3 * H), sh),
        # mu / logvar linears
        w_mu=u(ks[5], (L, H), sh), b_mu=u(ks[6], (1, L), sh),
        w_lv=u(ks[7], (L, H), sh), b_lv=u(ks[8], (1, L), sh),
        # decoder GRU (input_dim -> latent_size hidden)
        w_ih_d=u(ks[9], (3 * L, D), sl), w_hh_d=u(ks[10], (3 * L, L), sl),
        b_ih_d=u(ks[11], (1, 3 * L), sl), b_hh_d=u(ks[12], (1, 3 * L), sl),
        # readout latent -> input_dim
        w_out=u(ks[13], (D, L), sl), b_out=u(ks[14], (1, D), sl),
    )


# ----------------------------------------------------------------------------
# Wrapper (forward(smile, epoch))
# ----------------------------------------------------------------------------
def vae_forward(smile_btd, params, *, epoch, warmup, batch_size,
                hidden_size, latent_size):
    B, T, D = smile_btd.shape
    H, L = hidden_size, latent_size
    assert 3 * H <= GB and 3 * L <= GB and 2 * L <= GB and D <= LANE, \
        "packed single-block layout requires 3H, 3L, 2L <= 128 and D <= 128"
    Bp = _round_up(B, SUB)
    Dp = _round_up(D, LANE)            # == GB given D <= 128

    # beta = clamp(epoch * warmup, 0, warmup)  -- compile-time constant.
    beta = float(min(max(float(epoch) * float(warmup), 0.0), float(warmup)))

    # ---- data: time-major, SOS prepended as row-block 0, padded, flattened --
    x = jnp.transpose(smile_btd, (1, 0, 2)).astype(jnp.float32)      # (T,B,D)
    x = jnp.pad(x, ((0, 0), (0, Bp - B), (0, Dp - D)))               # (T,Bp,Dp)
    sos = jnp.pad(params["sos"].astype(jnp.float32), ((0, 0), (0, Dp - D)))
    sos_blk = jnp.broadcast_to(sos, (Bp, Dp))[None]                  # (1,Bp,Dp)
    x_ext = jnp.concatenate([sos_blk, x], axis=0).reshape((T + 1) * Bp, Dp)

    # batch-row validity mask, tiled over time blocks: (T*Bp, 1)
    bmask = (jnp.arange(Bp) < B).astype(jnp.float32)[:, None]
    mask_full = jnp.tile(bmask, (T, 1))

    # ---- weights: pre-transposed, zero-padded, one gate block per GRU -------
    w_ih = jnp.concatenate(
        [_pad2(params["w_ih_e"].T, Dp, GB), _pad2(params["w_ih_d"].T, Dp, GB)],
        axis=1)                                                      # (Dp, 2GB)
    w_mulv = jnp.concatenate([params["w_mu"].T, params["w_lv"].T], axis=1)
    w_enc = jnp.concatenate(
        [_pad2(params["w_hh_e"].T, H, GB), _pad2(w_mulv, H, GB)], axis=1)   # (H, 2GB)
    w_dec = jnp.concatenate(
        [_pad2(params["w_hh_d"].T, L, GB), _pad2(params["w_out"].T, L, Dp)],
        axis=1)                                                      # (L, 2GB)
    b_mulv = jnp.concatenate([params["b_mu"], params["b_lv"]], axis=1)
    biases = jnp.concatenate(
        [_pad2(params["b_ih_e"], 1, GB), _pad2(params["b_ih_d"], 1, GB),
         _pad2(params["b_hh_e"], 1, GB), _pad2(params["b_hh_d"], 1, GB),
         _pad2(b_mulv, 1, GB), _pad2(params["b_out"], 1, Dp)], axis=1)  # (1,6GB)

    kernel = functools.partial(
        vae_kernel, T=T, Bp=Bp, H=H, L=L, b_true=B, d_true=D,
        beta=beta, batch_size_const=batch_size)

    vmem = pl.BlockSpec(memory_space=pltpu.MemorySpace.VMEM)
    smem = pl.BlockSpec(memory_space=pltpu.MemorySpace.SMEM)

    loss, emb = pl.pallas_call(
        kernel,
        out_shape=(jax.ShapeDtypeStruct((1, 1), jnp.float32),
                   jax.ShapeDtypeStruct((Bp, H), jnp.float32)),
        in_specs=[vmem] * 6,
        out_specs=(smem, vmem),
        scratch_shapes=[
            pltpu.VMEM(((T + 1) * Bp, 2 * GB), jnp.float32),  # fused gi scratch
            pltpu.VMEM((T * Bp, L), jnp.float32),             # decoder h stash
        ],
    )(x_ext, mask_full, w_ih, w_enc, w_dec, biases)

    return loss[0, 0], emb[:B]


# ----------------------------------------------------------------------------
# Pure-JAX reference (same math, unpadded) for a sanity check
# ----------------------------------------------------------------------------
def vae_reference(smile_btd, params, *, epoch, warmup, batch_size,
                  hidden_size, latent_size):
    hp = lax.Precision.HIGHEST
    B, T, D = smile_btd.shape
    H, L = hidden_size, latent_size
    x = jnp.transpose(smile_btd, (1, 0, 2)).astype(jnp.float32)  # (T,B,D)

    def cell(x_t, h, w_ih, w_hh, b_ih, b_hh, hid):
        gi = jnp.dot(x_t, w_ih.T, precision=hp) + b_ih
        gh = jnp.dot(h, w_hh.T, precision=hp) + b_hh
        r = jax.nn.sigmoid(gi[:, :hid] + gh[:, :hid])
        z = jax.nn.sigmoid(gi[:, hid:2 * hid] + gh[:, hid:2 * hid])
        n = jnp.tanh(gi[:, 2 * hid:] + r * gh[:, 2 * hid:])
        return (1.0 - z) * n + z * h

    h = jnp.zeros((B, H), jnp.float32)
    for t in range(T):
        h = cell(x[t], h, params["w_ih_e"], params["w_hh_e"],
                 params["b_ih_e"], params["b_hh_e"], H)
    mu = jnp.dot(h, params["w_mu"].T, precision=hp) + params["b_mu"]
    logvar = jnp.dot(h, params["w_lv"].T, precision=hp) + params["b_lv"]
    z = mu

    dec_in = jnp.concatenate(
        [jnp.broadcast_to(params["sos"][:, None, :], (1, B, D)), x[:-1]], axis=0)
    h_d, sq = z, 0.0
    for t in range(T):
        h_d = cell(dec_in[t], h_d, params["w_ih_d"], params["w_hh_d"],
                   params["b_ih_d"], params["b_hh_d"], L)
        y_t = jnp.dot(h_d, params["w_out"].T, precision=hp) + params["b_out"]
        sq = sq + jnp.sum((x[t] - y_t) ** 2)

    recon = sq / (T * B * D)
    kld = 0.5 * jnp.mean(1.0 + logvar - mu * mu - jnp.exp(logvar))
    beta = min(max(float(epoch) * float(warmup), 0.0), float(warmup))
    loss = 0.1 * batch_size * (recon - beta * kld)
    return loss, h


# ----------------------------------------------------------------------------
if __name__ == "__main__":
    batch_size, seq_len = 4, 8
    input_dim, hidden_size, latent_size = 16, 32, 16
    warmup, epoch = 0.1, 3

    key = jax.random.PRNGKey(0)
    k_data, k_param = jax.random.split(key)
    smile = jax.random.normal(k_data, (batch_size, seq_len, input_dim),
                              jnp.float32)
    params = init_params(k_param, input_dim, hidden_size, latent_size)

    loss, molecule_emb = vae_forward(
        smile, params, epoch=epoch, warmup=warmup, batch_size=batch_size,
        hidden_size=hidden_size, latent_size=latent_size)
    jax.block_until_ready((loss, molecule_emb))

    ref_loss, ref_emb = vae_reference(
        smile, params, epoch=epoch, warmup=warmup, batch_size=batch_size,
        hidden_size=hidden_size, latent_size=latent_size)

    assert jnp.allclose(loss, ref_loss, rtol=1e-3, atol=3e-4), (loss, ref_loss)
    assert jnp.allclose(molecule_emb, ref_emb, rtol=1e-3, atol=3e-4)

    print("KERNEL_OK")
</pallas_src>

<mosaic_0001>
module attributes {stable_mosaic.version = 11 : i64} {
  func.func @vae_kernel(%arg0: memref<72x128xf32, #tpu.memory_space<vmem>>, %arg1: memref<64x1xf32, #tpu.memory_space<vmem>>, %arg2: memref<128x256xf32, #tpu.memory_space<vmem>>, %arg3: memref<32x256xf32, #tpu.memory_space<vmem>>, %arg4: memref<16x256xf32, #tpu.memory_space<vmem>>, %arg5: memref<1x768xf32, #tpu.memory_space<vmem>>, %arg6: memref<1x1xf32, #tpu.memory_space<smem>>, %arg7: memref<8x32xf32, #tpu.memory_space<vmem>>, %arg8: memref<72x256xf32, #tpu.memory_space<vmem>>, %arg9: memref<64x16xf32, #tpu.memory_space<vmem>>) attributes {dimension_semantics = [], scalar_prefetch = 0 : i64, scratch_operands = 2 : i64, tpu.core_type = #tpu.core_type<tc>} {
    %c0 = arith.constant 0 : index
    %c0_0 = arith.constant 0 : index
    %0 = vector.load %arg0[%c0, %c0_0] : memref<72x128xf32, #tpu.memory_space<vmem>>, vector<72x128xf32>
    %c0_1 = arith.constant 0 : index
    %c0_2 = arith.constant 0 : index
    %1 = vector.load %arg2[%c0_1, %c0_2] : memref<128x256xf32, #tpu.memory_space<vmem>>, vector<128x256xf32>
    %cst = arith.constant dense<0.000000e+00> : vector<72x256xf32>
    %2 = tpu.matmul %0, %1, %cst {dimension_numbers = #tpu.dot_dimension_numbers<[1], [0], [0], [1], [0, 0, 1, 1], [], []>} : vector<72x128xf32>, vector<128x256xf32>, vector<72x256xf32> -> vector<72x256xf32>
    %c0_3 = arith.constant 0 : index
    %c0_4 = arith.constant 0 : index
    %3 = vector.load %arg5[%c0_3, %c0_4] : memref<1x768xf32, #tpu.memory_space<vmem>>, vector<1x256xf32>
    %4 = vector.broadcast %3 : vector<1x256xf32> to vector<72x256xf32>
    %5 = arith.addf %2, %4 : vector<72x256xf32>
    %c0_5 = arith.constant 0 : index
    %c0_6 = arith.constant 0 : index
    %6 = vector.load %arg8[%c0_5, %c0_6] : memref<72x256xf32, #tpu.memory_space<vmem>>, vector<72x256xf32>
    tpu.vector_store %arg8[%c0_5, %c0_6], %5 {strides = array<i32>} : memref<72x256xf32, #tpu.memory_space<vmem>>, vector<72x256xf32>,
    %c0_7 = arith.constant 0 : index
    %c0_8 = arith.constant 0 : index
    %7 = vector.load %arg3[%c0_7, %c0_8] : memref<32x256xf32, #tpu.memory_space<vmem>>, vector<32x128xf32>
    %c0_9 = arith.constant 0 : index
    %c256 = arith.constant 256 : index
    %8 = vector.load %arg5[%c0_9, %c256] : memref<1x768xf32, #tpu.memory_space<vmem>>, vector<1x128xf32>
    %cst_10 = arith.constant 0.000000e+00 : f32
    %9 = vector.broadcast %cst_10 : f32 to vector<8x32xf32>
    %c8 = arith.constant 8 : index
    %c0_11 = arith.constant 0 : index
    %10 = vector.load %arg8[%c8, %c0_11] : memref<72x256xf32, #tpu.memory_space<vmem>>, vector<8x128xf32>
    %cst_12 = arith.constant dense<0.000000e+00> : vector<8x128xf32>
    %11 = tpu.matmul %9, %7, %cst_12 {dimension_numbers = #tpu.dot_dimension_numbers<[1], [0], [0], [1], [0, 0, 1, 1], [], []>} : vector<8x32xf32>, vector<32x128xf32>, vector<8x128xf32> -> vector<8x128xf32>
    %12 = vector.broadcast %8 : vector<1x128xf32> to vector<8x128xf32>
    %13 = arith.addf %11, %12 : vector<8x128xf32>
    %14 = vector.extract_strided_slice %10 {offsets = [0, 0], sizes = [8, 32], strides = [1, 1]} : vector<8x128xf32> to vector<8x32xf32>
    %15 = vector.extract_strided_slice %13 {offsets = [0, 0], sizes = [8, 32], strides = [1, 1]} : vector<8x128xf32> to vector<8x32xf32>
    %16 = arith.addf %14, %15 : vector<8x32xf32>
    %17 = arith.negf %16 : vector<8x32xf32>
    %18 = math.exp %17 : vector<8x32xf32>
    %cst_13 = arith.constant 1.000000e+00 : f32
    %19 = vector.broadcast %cst_13 : f32 to vector<8x32xf32>
    %20 = arith.addf %19, %18 : vector<8x32xf32>
    %21 = arith.divf %19, %20 : vector<8x32xf32>
    %22 = vector.extract_strided_slice %10 {offsets = [0, 32], sizes = [8, 32], strides = [1, 1]} : vector<8x128xf32> to vector<8x32xf32>
    %23 = vector.extract_strided_slice %13 {offsets = [0, 32], sizes = [8, 32], strides = [1, 1]} : vector<8x128xf32> to vector<8x32xf32>
    %24 = arith.addf %22, %23 : vector<8x32xf32>
    %25 = arith.negf %24 : vector<8x32xf32>
    %26 = math.exp %25 : vector<8x32xf32>
    %cst_14 = arith.constant 1.000000e+00 : f32
    %27 = vector.broadcast %cst_14 : f32 to vector<8x32xf32>
    %28 = arith.addf %27, %26 : vector<8x32xf32>
    %29 = arith.divf %27, %28 : vector<8x32xf32>
    %30 = vector.extract_strided_slice %10 {offsets = [0, 64], sizes = [8, 32], strides = [1, 1]} : vector<8x128xf32> to vector<8x32xf32>
    %31 = vector.extract_strided_slice %13 {offsets = [0, 64], sizes = [8, 32], strides = [1, 1]} : vector<8x128xf32> to vector<8x32xf32>
    %32 = arith.mulf %21, %31 : vector<8x32xf32>
    %33 = arith.addf %30, %32 : vector<8x32xf32>
    %34 = math.tanh %33 : vector<8x32xf32>
    %cst_15 = arith.constant 1.000000e+00 : f32
    %35 = vector.broadcast %cst_15 : f32 to vector<8x32xf32>
    %36 = arith.subf %35, %29 : vector<8x32xf32>
    %37 = arith.mulf %36, %34 : vector<8x32xf32>
    %38 = arith.mulf %29, %9 : vector<8x32xf32>
    %39 = arith.addf %37, %38 : vector<8x32xf32>
    %c16 = arith.constant 16 : index
    %c0_16 = arith.constant 0 : index
    %40 = vector.load %arg8[%c16, %c0_16] : memref<72x256xf32, #tpu.memory_space<vmem>>, vector<8x128xf32>
    %cst_17 = arith.constant dense<0.000000e+00> : vector<8x128xf32>
    %41 = tpu.matmul %39, %7, %cst_17 {dimension_numbers = #tpu.dot_dimension_numbers<[1], [0], [0], [1], [0, 0, 1, 1], [], []>} : vector<8x32xf32>, vector<32x128xf32>, vector<8x128xf32> -> vector<8x128xf32>
    %42 = vector.broadcast %8 : vector<1x128xf32> to vector<8x128xf32>
    %43 = arith.addf %41, %42 : vector<8x128xf32>
    %44 = vector.extract_strided_slice %40 {offsets = [0, 0], sizes = [8, 32], strides = [1, 1]} : vector<8x128xf32> to vector<8x32xf32>
    %45 = vector.extract_strided_slice %43 {offsets = [0, 0], sizes = [8, 32], strides = [1, 1]} : vector<8x128xf32> to vector<8x32xf32>
    %46 = arith.addf %44, %45 : vector<8x32xf32>
    %47 = arith.negf %46 : vector<8x32xf32>
    %48 = math.exp %47 : vector<8x32xf32>
    %cst_18 = arith.constant 1.000000e+00 : f32
    %49 = vector.broadcast %cst_18 : f32 to vector<8x32xf32>
    %50 = arith.addf %49, %48 : vector<8x32xf32>
    %51 = arith.divf %49, %50 : vector<8x32xf32>
    %52 = vector.extract_strided_slice %40 {offsets = [0, 32], sizes = [8, 32], strides = [1, 1]} : vector<8x128xf32> to vector<8x32xf32>
    %53 = vector.extract_strided_slice %43 {offsets = [0, 32], sizes = [8, 32], strides = [1, 1]} : vector<8x128xf32> to vector<8x32xf32>
    %54 = arith.addf %52, %53 : vector<8x32xf32>
    %55 = arith.negf %54 : vector<8x32xf32>
    %56 = math.exp %55 : vector<8x32xf32>
    %cst_19 = arith.constant 1.000000e+00 : f32
    %57 = vector.broadcast %cst_19 : f32 to vector<8x32xf32>
    %58 = arith.addf %57, %56 : vector<8x32xf32>
    %59 = arith.divf %57, %58 : vector<8x32xf32>
    %60 = vector.extract_strided_slice %40 {offsets = [0, 64], sizes = [8, 32], strides = [1, 1]} : vector<8x128xf32> to vector<8x32xf32>
    %61 = vector.extract_strided_slice %43 {offsets = [0, 64], sizes = [8, 32], strides = [1, 1]} : vector<8x128xf32> to vector<8x32xf32>
    %62 = arith.mulf %51, %61 : vector<8x32xf32>
    %63 = arith.addf %60, %62 : vector<8x32xf32>
    %64 = math.tanh %63 : vector<8x32xf32>
    %cst_20 = arith.constant 1.000000e+00 : f32
    %65 = vector.broadcast %cst_20 : f32 to vector<8x32xf32>
    %66 = arith.subf %65, %59 : vector<8x32xf32>
    %67 = arith.mulf %66, %64 : vector<8x32xf32>
    %68 = arith.mulf %59, %39 : vector<8x32xf32>
    %69 = arith.addf %67, %68 : vector<8x32xf32>
    %c24 = arith.constant 24 : index
    %c0_21 = arith.constant 0 : index
    %70 = vector.load %arg8[%c24, %c0_21] : memref<72x256xf32, #tpu.memory_space<vmem>>, vector<8x128xf32>
    %cst_22 = arith.constant dense<0.000000e+00> : vector<8x128xf32>
    %71 = tpu.matmul %69, %7, %cst_22 {dimension_numbers = #tpu.dot_dimension_numbers<[1], [0], [0], [1], [0, 0, 1, 1], [], []>} : vector<8x32xf32>, vector<32x128xf32>, vector<8x128xf32> -> vector<8x128xf32>
    %72 = vector.broadcast %8 : vector<1x128xf32> to vector<8x128xf32>
    %73 = arith.addf %71, %72 : vector<8x128xf32>
    %74 = vector.extract_strided_slice %70 {offsets = [0, 0], sizes = [8, 32], strides = [1, 1]} : vector<8x128xf32> to vector<8x32xf32>
    %75 = vector.extract_strided_slice %73 {offsets = [0, 0], sizes = [8, 32], strides = [1, 1]} : vector<8x128xf32> to vector<8x32xf32>
    %76 = arith.addf %74, %75 : vector<8x32xf32>
    %77 = arith.negf %76 : vector<8x32xf32>
    %78 = math.exp %77 : vector<8x32xf32>
    %cst_23 = arith.constant 1.000000e+00 : f32
    %79 = vector.broadcast %cst_23 : f32 to vector<8x32xf32>
    %80 = arith.addf %79, %78 : vector<8x32xf32>
    %81 = arith.divf %79, %80 : vector<8x32xf32>
    %82 = vector.extract_strided_slice %70 {offsets = [0, 32], sizes = [8, 32], strides = [1, 1]} : vector<8x128xf32> to vector<8x32xf32>
    %83 = vector.extract_strided_slice %73 {offsets = [0, 32], sizes = [8, 32], strides = [1, 1]} : vector<8x128xf32> to vector<8x32xf32>
    %84 = arith.addf %82, %83 : vector<8x32xf32>
    %85 = arith.negf %84 : vector<8x32xf32>
    %86 = math.exp %85 : vector<8x32xf32>
    %cst_24 = arith.constant 1.000000e+00 : f32
    %87 = vector.broadcast %cst_24 : f32 to vector<8x32xf32>
    %88 = arith.addf %87, %86 : vector<8x32xf32>
    %89 = arith.divf %87, %88 : vector<8x32xf32>
    %90 = vector.extract_strided_slice %70 {offsets = [0, 64], sizes = [8, 32], strides = [1, 1]} : vector<8x128xf32> to vector<8x32xf32>
    %91 = vector.extract_strided_slice %73 {offsets = [0, 64], sizes = [8, 32], strides = [1, 1]} : vector<8x128xf32> to vector<8x32xf32>
    %92 = arith.mulf %81, %91 : vector<8x32xf32>
    %93 = arith.addf %90, %92 : vector<8x32xf32>
    %94 = math.tanh %93 : vector<8x32xf32>
    %cst_25 = arith.constant 1.000000e+00 : f32
    %95 = vector.broadcast %cst_25 : f32 to vector<8x32xf32>
    %96 = arith.subf %95, %89 : vector<8x32xf32>
    %97 = arith.mulf %96, %94 : vector<8x32xf32>
    %98 = arith.mulf %89, %69 : vector<8x32xf32>
    %99 = arith.addf %97, %98 : vector<8x32xf32>
    %c32 = arith.constant 32 : index
    %c0_26 = arith.constant 0 : index
    %100 = vector.load %arg8[%c32, %c0_26] : memref<72x256xf32, #tpu.memory_space<vmem>>, vector<8x128xf32>
    %cst_27 = arith.constant dense<0.000000e+00> : vector<8x128xf32>
    %101 = tpu.matmul %99, %7, %cst_27 {dimension_numbers = #tpu.dot_dimension_numbers<[1], [0], [0], [1], [0, 0, 1, 1], [], []>} : vector<8x32xf32>, vector<32x128xf32>, vector<8x128xf32> -> vector<8x128xf32>
    %102 = vector.broadcast %8 : vector<1x128xf32> to vector<8x128xf32>
    %103 = arith.addf %101, %102 : vector<8x128xf32>
    %104 = vector.extract_strided_slice %100 {offsets = [0, 0], sizes = [8, 32], strides = [1, 1]} : vector<8x128xf32> to vector<8x32xf32>
    %105 = vector.extract_strided_slice %103 {offsets = [0, 0], sizes = [8, 32], strides = [1, 1]} : vector<8x128xf32> to vector<8x32xf32>
    %106 = arith.addf %104, %105 : vector<8x32xf32>
    %107 = arith.negf %106 : vector<8x32xf32>
    %108 = math.exp %107 : vector<8x32xf32>
    %cst_28 = arith.constant 1.000000e+00 : f32
    %109 = vector.broadcast %cst_28 : f32 to vector<8x32xf32>
    %110 = arith.addf %109, %108 : vector<8x32xf32>
    %111 = arith.divf %109, %110 : vector<8x32xf32>
    %112 = vector.extract_strided_slice %100 {offsets = [0, 32], sizes = [8, 32], strides = [1, 1]} : vector<8x128xf32> to vector<8x32xf32>
    %113 = vector.extract_strided_slice %103 {offsets = [0, 32], sizes = [8, 32], strides = [1, 1]} : vector<8x128xf32> to vector<8x32xf32>
    %114 = arith.addf %112, %113 : vector<8x32xf32>
    %115 = arith.negf %114 : vector<8x32xf32>
    %116 = math.exp %115 : vector<8x32xf32>
    %cst_29 = arith.constant 1.000000e+00 : f32
    %117 = vector.broadcast %cst_29 : f32 to vector<8x32xf32>
    %118 = arith.addf %117, %116 : vector<8x32xf32>
    %119 = arith.divf %117, %118 : vector<8x32xf32>
    %120 = vector.extract_strided_slice %100 {offsets = [0, 64], sizes = [8, 32], strides = [1, 1]} : vector<8x128xf32> to vector<8x32xf32>
    %121 = vector.extract_strided_slice %103 {offsets = [0, 64], sizes = [8, 32], strides = [1, 1]} : vector<8x128xf32> to vector<8x32xf32>
    %122 = arith.mulf %111, %121 : vector<8x32xf32>
    %123 = arith.addf %120, %122 : vector<8x32xf32>
    %124 = math.tanh %123 : vector<8x32xf32>
    %cst_30 = arith.constant 1.000000e+00 : f32
    %125 = vector.broadcast %cst_30 : f32 to vector<8x32xf32>
    %126 = arith.subf %125, %119 : vector<8x32xf32>
    %127 = arith.mulf %126, %124 : vector<8x32xf32>
    %128 = arith.mulf %119, %99 : vector<8x32xf32>
    %129 = arith.addf %127, %128 : vector<8x32xf32>
    %c40 = arith.constant 40 : index
    %c0_31 = arith.constant 0 : index
    %130 = vector.load %arg8[%c40, %c0_31] : memref<72x256xf32, #tpu.memory_space<vmem>>, vector<8x128xf32>
    %cst_32 = arith.constant dense<0.000000e+00> : vector<8x128xf32>
    %131 = tpu.matmul %129, %7, %cst_32 {dimension_numbers = #tpu.dot_dimension_numbers<[1], [0], [0], [1], [0, 0, 1, 1], [], []>} : vector<8x32xf32>, vector<32x128xf32>, vector<8x128xf32> -> vector<8x128xf32>
    %132 = vector.broadcast %8 : vector<1x128xf32> to vector<8x128xf32>
    %133 = arith.addf %131, %132 : vector<8x128xf32>
    %134 = vector.extract_strided_slice %130 {offsets = [0, 0], sizes = [8, 32], strides = [1, 1]} : vector<8x128xf32> to vector<8x32xf32>
    %135 = vector.extract_strided_slice %133 {offsets = [0, 0], sizes = [8, 32], strides = [1, 1]} : vector<8x128xf32> to vector<8x32xf32>
    %136 = arith.addf %134, %135 : vector<8x32xf32>
    %137 = arith.negf %136 : vector<8x32xf32>
    %138 = math.exp %137 : vector<8x32xf32>
    %cst_33 = arith.constant 1.000000e+00 : f32
    %139 = vector.broadcast %cst_33 : f32 to vector<8x32xf32>
    %140 = arith.addf %139, %138 : vector<8x32xf32>
    %141 = arith.divf %139, %140 : vector<8x32xf32>
    %142 = vector.extract_strided_slice %130 {offsets = [0, 32], sizes = [8, 32], strides = [1, 1]} : vector<8x128xf32> to vector<8x32xf32>
    %143 = vector.extract_strided_slice %133 {offsets = [0, 32], sizes = [8, 32], strides = [1, 1]} : vector<8x128xf32> to vector<8x32xf32>
    %144 = arith.addf %142, %143 : vector<8x32xf32>
    %145 = arith.negf %144 : vector<8x32xf32>
    %146 = math.exp %145 : vector<8x32xf32>
    %cst_34 = arith.constant 1.000000e+00 : f32
    %147 = vector.broadcast %cst_34 : f32 to vector<8x32xf32>
    %148 = arith.addf %147, %146 : vector<8x32xf32>
    %149 = arith.divf %147, %148 : vector<8x32xf32>
    %150 = vector.extract_strided_slice %130 {offsets = [0, 64], sizes = [8, 32], strides = [1, 1]} : vector<8x128xf32> to vector<8x32xf32>
    %151 = vector.extract_strided_slice %133 {offsets = [0, 64], sizes = [8, 32], strides = [1, 1]} : vector<8x128xf32> to vector<8x32xf32>
    %152 = arith.mulf %141, %151 : vector<8x32xf32>
    %153 = arith.addf %150, %152 : vector<8x32xf32>
    %154 = math.tanh %153 : vector<8x32xf32>
    %cst_35 = arith.constant 1.000000e+00 : f32
    %155 = vector.broadcast %cst_35 : f32 to vector<8x32xf32>
    %156 = arith.subf %155, %149 : vector<8x32xf32>
    %157 = arith.mulf %156, %154 : vector<8x32xf32>
    %158 = arith.mulf %149, %129 : vector<8x32xf32>
    %159 = arith.addf %157, %158 : vector<8x32xf32>
    %c48 = arith.constant 48 : index
    %c0_36 = arith.constant 0 : index
    %160 = vector.load %arg8[%c48, %c0_36] : memref<72x256xf32, #tpu.memory_space<vmem>>, vector<8x128xf32>
    %cst_37 = arith.constant dense<0.000000e+00> : vector<8x128xf32>
    %161 = tpu.matmul %159, %7, %cst_37 {dimension_numbers = #tpu.dot_dimension_numbers<[1], [0], [0], [1], [0, 0, 1, 1], [], []>} : vector<8x32xf32>, vector<32x128xf32>, vector<8x128xf32> -> vector<8x128xf32>
    %162 = vector.broadcast %8 : vector<1x128xf32> to vector<8x128xf32>
    %163 = arith.addf %161, %162 : vector<8x128xf32>
    %164 = vector.extract_strided_slice %160 {offsets = [0, 0], sizes = [8, 32], strides = [1, 1]} : vector<8x128xf32> to vector<8x32xf32>
    %165 = vector.extract_strided_slice %163 {offsets = [0, 0], sizes = [8, 32], strides = [1, 1]} : vector<8x128xf32> to vector<8x32xf32>
    %166 = arith.addf %164, %165 : vector<8x32xf32>
    %167 = arith.negf %166 : vector<8x32xf32>
    %168 = math.exp %167 : vector<8x32xf32>
    %cst_38 = arith.constant 1.000000e+00 : f32
    %169 = vector.broadcast %cst_38 : f32 to vector<8x32xf32>
    %170 = arith.addf %169, %168 : vector<8x32xf32>
    %171 = arith.divf %169, %170 : vector<8x32xf32>
    %172 = vector.extract_strided_slice %160 {offsets = [0, 32], sizes = [8, 32], strides = [1, 1]} : vector<8x128xf32> to vector<8x32xf32>
    %173 = vector.extract_strided_slice %163 {offsets = [0, 32], sizes = [8, 32], strides = [1, 1]} : vector<8x128xf32> to vector<8x32xf32>
    %174 = arith.addf %172, %173 : vector<8x32xf32>
    %175 = arith.negf %174 : vector<8x32xf32>
    %176 = math.exp %175 : vector<8x32xf32>
    %cst_39 = arith.constant 1.000000e+00 : f32
    %177 = vector.broadcast %cst_39 : f32 to vector<8x32xf32>
    %178 = arith.addf %177, %176 : vector<8x32xf32>
    %179 = arith.divf %177, %178 : vector<8x32xf32>
    %180 = vector.extract_strided_slice %160 {offsets = [0, 64], sizes = [8, 32], strides = [1, 1]} : vector<8x128xf32> to vector<8x32xf32>
    %181 = vector.extract_strided_slice %163 {offsets = [0, 64], sizes = [8, 32], strides = [1, 1]} : vector<8x128xf32> to vector<8x32xf32>
    %182 = arith.mulf %171, %181 : vector<8x32xf32>
    %183 = arith.addf %180, %182 : vector<8x32xf32>
    %184 = math.tanh %183 : vector<8x32xf32>
    %cst_40 = arith.constant 1.000000e+00 : f32
    %185 = vector.broadcast %cst_40 : f32 to vector<8x32xf32>
    %186 = arith.subf %185, %179 : vector<8x32xf32>
    %187 = arith.mulf %186, %184 : vector<8x32xf32>
    %188 = arith.mulf %179, %159 : vector<8x32xf32>
    %189 = arith.addf %187, %188 : vector<8x32xf32>
    %c56 = arith.constant 56 : index
    %c0_41 = arith.constant 0 : index
    %190 = vector.load %arg8[%c56, %c0_41] : memref<72x256xf32, #tpu.memory_space<vmem>>, vector<8x128xf32>
    %cst_42 = arith.constant dense<0.000000e+00> : vector<8x128xf32>
    %191 = tpu.matmul %189, %7, %cst_42 {dimension_numbers = #tpu.dot_dimension_numbers<[1], [0], [0], [1], [0, 0, 1, 1], [], []>} : vector<8x32xf32>, vector<32x128xf32>, vector<8x128xf32> -> vector<8x128xf32>
    %192 = vector.broadcast %8 : vector<1x128xf32> to vector<8x128xf32>
    %193 = arith.addf %191, %192 : vector<8x128xf32>
    %194 = vector.extract_strided_slice %190 {offsets = [0, 0], sizes = [8, 32], strides = [1, 1]} : vector<8x128xf32> to vector<8x32xf32>
    %195 = vector.extract_strided_slice %193 {offsets = [0, 0], sizes = [8, 32], strides = [1, 1]} : vector<8x128xf32> to vector<8x32xf32>
    %196 = arith.addf %194, %195 : vector<8x32xf32>
    %197 = arith.negf %196 : vector<8x32xf32>
    %198 = math.exp %197 : vector<8x32xf32>
    %cst_43 = arith.constant 1.000000e+00 : f32
    %199 = vector.broadcast %cst_43 : f32 to vector<8x32xf32>
    %200 = arith.addf %199, %198 : vector<8x32xf32>
    %201 = arith.divf %199, %200 : vector<8x32xf32>
    %202 = vector.extract_strided_slice %190 {offsets = [0, 32], sizes = [8, 32], strides = [1, 1]} : vector<8x128xf32> to vector<8x32xf32>
    %203 = vector.extract_strided_slice %193 {offsets = [0, 32], sizes = [8, 32], strides = [1, 1]} : vector<8x128xf32> to vector<8x32xf32>
    %204 = arith.addf %202, %203 : vector<8x32xf32>
    %205 = arith.negf %204 : vector<8x32xf32>
    %206 = math.exp %205 : vector<8x32xf32>
    %cst_44 = arith.constant 1.000000e+00 : f32
    %207 = vector.broadcast %cst_44 : f32 to vector<8x32xf32>
    %208 = arith.addf %207, %206 : vector<8x32xf32>
    %209 = arith.divf %207, %208 : vector<8x32xf32>
    %210 = vector.extract_strided_slice %190 {offsets = [0, 64], sizes = [8, 32], strides = [1, 1]} : vector<8x128xf32> to vector<8x32xf32>
    %211 = vector.extract_strided_slice %193 {offsets = [0, 64], sizes = [8, 32], strides = [1, 1]} : vector<8x128xf32> to vector<8x32xf32>
    %212 = arith.mulf %201, %211 : vector<8x32xf32>
    %213 = arith.addf %210, %212 : vector<8x32xf32>
    %214 = math.tanh %213 : vector<8x32xf32>
    %cst_45 = arith.constant 1.000000e+00 : f32
    %215 = vector.broadcast %cst_45 : f32 to vector<8x32xf32>
    %216 = arith.subf %215, %209 : vector<8x32xf32>
    %217 = arith.mulf %216, %214 : vector<8x32xf32>
    %218 = arith.mulf %209, %189 : vector<8x32xf32>
    %219 = arith.addf %217, %218 : vector<8x32xf32>
    %c64 = arith.constant 64 : index
    %c0_46 = arith.constant 0 : index
    %220 = vector.load %arg8[%c64, %c0_46] : memref<72x256xf32, #tpu.memory_space<vmem>>, vector<8x128xf32>
    %cst_47 = arith.constant dense<0.000000e+00> : vector<8x128xf32>
    %221 = tpu.matmul %219, %7, %cst_47 {dimension_numbers = #tpu.dot_dimension_numbers<[1], [0], [0], [1], [0, 0, 1, 1], [], []>} : vector<8x32xf32>, vector<32x128xf32>, vector<8x128xf32> -> vector<8x128xf32>
    %222 = vector.broadcast %8 : vector<1x128xf32> to vector<8x128xf32>
    %223 = arith.addf %221, %222 : vector<8x128xf32>
    %224 = vector.extract_strided_slice %220 {offsets = [0, 0], sizes = [8, 32], strides = [1, 1]} : vector<8x128xf32> to vector<8x32xf32>
    %225 = vector.extract_strided_slice %223 {offsets = [0, 0], sizes = [8, 32], strides = [1, 1]} : vector<8x128xf32> to vector<8x32xf32>
    %226 = arith.addf %224, %225 : vector<8x32xf32>
    %227 = arith.negf %226 : vector<8x32xf32>
    %228 = math.exp %227 : vector<8x32xf32>
    %cst_48 = arith.constant 1.000000e+00 : f32
    %229 = vector.broadcast %cst_48 : f32 to vector<8x32xf32>
    %230 = arith.addf %229, %228 : vector<8x32xf32>
    %231 = arith.divf %229, %230 : vector<8x32xf32>
    %232 = vector.extract_strided_slice %220 {offsets = [0, 32], sizes = [8, 32], strides = [1, 1]} : vector<8x128xf32> to vector<8x32xf32>
    %233 = vector.extract_strided_slice %223 {offsets = [0, 32], sizes = [8, 32], strides = [1, 1]} : vector<8x128xf32> to vector<8x32xf32>
    %234 = arith.addf %232, %233 : vector<8x32xf32>
    %235 = arith.negf %234 : vector<8x32xf32>
    %236 = math.exp %235 : vector<8x32xf32>
    %cst_49 = arith.constant 1.000000e+00 : f32
    %237 = vector.broadcast %cst_49 : f32 to vector<8x32xf32>
    %238 = arith.addf %237, %236 : vector<8x32xf32>
    %239 = arith.divf %237, %238 : vector<8x32xf32>
    %240 = vector.extract_strided_slice %220 {offsets = [0, 64], sizes = [8, 32], strides = [1, 1]} : vector<8x128xf32> to vector<8x32xf32>
    %241 = vector.extract_strided_slice %223 {offsets = [0, 64], sizes = [8, 32], strides = [1, 1]} : vector<8x128xf32> to vector<8x32xf32>
    %242 = arith.mulf %231, %241 : vector<8x32xf32>
    %243 = arith.addf %240, %242 : vector<8x32xf32>
    %244 = math.tanh %243 : vector<8x32xf32>
    %cst_50 = arith.constant 1.000000e+00 : f32
    %245 = vector.broadcast %cst_50 : f32 to vector<8x32xf32>
    %246 = arith.subf %245, %239 : vector<8x32xf32>
    %247 = arith.mulf %246, %244 : vector<8x32xf32>
    %248 = arith.mulf %239, %219 : vector<8x32xf32>
    %249 = arith.addf %247, %248 : vector<8x32xf32>
    %c0_51 = arith.constant 0 : index
    %c128 = arith.constant 128 : index
    %250 = vector.load %arg3[%c0_51, %c128] : memref<32x256xf32, #tpu.memory_space<vmem>>, vector<32x128xf32>
    %cst_52 = arith.constant dense<0.000000e+00> : vector<8x128xf32>
    %251 = tpu.matmul %249, %250, %cst_52 {dimension_numbers = #tpu.dot_dimension_numbers<[1], [0], [0], [1], [0, 0, 1, 1], [], []>} : vector<8x32xf32>, vector<32x128xf32>, vector<8x128xf32> -> vector<8x128xf32>
    %c0_53 = arith.constant 0 : index
    %c512 = arith.constant 512 : index
    %252 = vector.load %arg5[%c0_53, %c512] : memref<1x768xf32, #tpu.memory_space<vmem>>, vector<1x128xf32>
    %253 = vector.broadcast %252 : vector<1x128xf32> to vector<8x128xf32>
    %254 = arith.addf %251, %253 : vector<8x128xf32>
    %255 = vector.extract_strided_slice %254 {offsets = [0, 0], sizes = [8, 16], strides = [1, 1]} : vector<8x128xf32> to vector<8x16xf32>
    %256 = vector.extract_strided_slice %254 {offsets = [0, 16], sizes = [8, 16], strides = [1, 1]} : vector<8x128xf32> to vector<8x16xf32>
    %c0_54 = arith.constant 0 : index
    %c0_55 = arith.constant 0 : index
    %257 = vector.load %arg4[%c0_54, %c0_55] : memref<16x256xf32, #tpu.memory_space<vmem>>, vector<16x128xf32>
    %c0_56 = arith.constant 0 : index
    %c384 = arith.constant 384 : index
    %258 = vector.load %arg5[%c0_56, %c384] : memref<1x768xf32, #tpu.memory_space<vmem>>, vector<1x128xf32>
    %c0_57 = arith.constant 0 : index
    %c128_58 = arith.constant 128 : index
    %259 = vector.load %arg8[%c0_57, %c128_58] : memref<72x256xf32, #tpu.memory_space<vmem>>, vector<8x128xf32>
    %cst_59 = arith.constant dense<0.000000e+00> : vector<8x128xf32>
    %260 = tpu.matmul %255, %257, %cst_59 {dimension_numbers = #tpu.dot_dimension_numbers<[1], [0], [0], [1], [0, 0, 1, 1], [], []>} : vector<8x16xf32>, vector<16x128xf32>, vector<8x128xf32> -> vector<8x128xf32>
    %261 = vector.broadcast %258 : vector<1x128xf32> to vector<8x128xf32>
    %262 = arith.addf %260, %261 : vector<8x128xf32>
    %263 = vector.extract_strided_slice %259 {offsets = [0, 0], sizes = [8, 16], strides = [1, 1]} : vector<8x128xf32> to vector<8x16xf32>
    %264 = vector.extract_strided_slice %262 {offsets = [0, 0], sizes = [8, 16], strides = [1, 1]} : vector<8x128xf32> to vector<8x16xf32>
    %265 = arith.addf %263, %264 : vector<8x16xf32>
    %266 = arith.negf %265 : vector<8x16xf32>
    %267 = math.exp %266 : vector<8x16xf32>
    %cst_60 = arith.constant 1.000000e+00 : f32
    %268 = vector.broadcast %cst_60 : f32 to vector<8x16xf32>
    %269 = arith.addf %268, %267 : vector<8x16xf32>
    %270 = arith.divf %268, %269 : vector<8x16xf32>
    %271 = vector.extract_strided_slice %259 {offsets = [0, 16], sizes = [8, 16], strides = [1, 1]} : vector<8x128xf32> to vector<8x16xf32>
    %272 = vector.extract_strided_slice %262 {offsets = [0, 16], sizes = [8, 16], strides = [1, 1]} : vector<8x128xf32> to vector<8x16xf32>
    %273 = arith.addf %271, %272 : vector<8x16xf32>
    %274 = arith.negf %273 : vector<8x16xf32>
    %275 = math.exp %274 : vector<8x16xf32>
    %cst_61 = arith.constant 1.000000e+00 : f32
    %276 = vector.broadcast %cst_61 : f32 to vector<8x16xf32>
    %277 = arith.addf %276, %275 : vector<8x16xf32>
    %278 = arith.divf %276, %277 : vector<8x16xf32>
    %279 = vector.extract_strided_slice %259 {offsets = [0, 32], sizes = [8, 16], strides = [1, 1]} : vector<8x128xf32> to vector<8x16xf32>
    %280 = vector.extract_strided_slice %262 {offsets = [0, 32], sizes = [8, 16], strides = [1, 1]} : vector<8x128xf32> to vector<8x16xf32>
    %281 = arith.mulf %270, %280 : vector<8x16xf32>
    %282 = arith.addf %279, %281 : vector<8x16xf32>
    %283 = math.tanh %282 : vector<8x16xf32>
    %cst_62 = arith.constant 1.000000e+00 : f32
    %284 = vector.broadcast %cst_62 : f32 to vector<8x16xf32>
    %285 = arith.subf %284, %278 : vector<8x16xf32>
    %286 = arith.mulf %285, %283 : vector<8x16xf32>
    %287 = arith.mulf %278, %255 : vector<8x16xf32>
    %288 = arith.addf %286, %287 : vector<8x16xf32>
    %c0_63 = arith.constant 0 : index
    %c0_64 = arith.constant 0 : index
    %289 = vector.load %arg9[%c0_63, %c0_64] : memref<64x16xf32, #tpu.memory_space<vmem>>, vector<8x16xf32>
    tpu.vector_store %arg9[%c0_63, %c0_64], %288 {strides = array<i32>} : memref<64x16xf32, #tpu.memory_space<vmem>>, vector<8x16xf32>,
    %c8_65 = arith.constant 8 : index
    %c128_66 = arith.constant 128 : index
    %290 = vector.load %arg8[%c8_65, %c128_66] : memref<72x256xf32, #tpu.memory_space<vmem>>, vector<8x128xf32>
    %cst_67 = arith.constant dense<0.000000e+00> : vector<8x128xf32>
    %291 = tpu.matmul %288, %257, %cst_67 {dimension_numbers = #tpu.dot_dimension_numbers<[1], [0], [0], [1], [0, 0, 1, 1], [], []>} : vector<8x16xf32>, vector<16x128xf32>, vector<8x128xf32> -> vector<8x128xf32>
    %292 = vector.broadcast %258 : vector<1x128xf32> to vector<8x128xf32>
    %293 = arith.addf %291, %292 : vector<8x128xf32>
    %294 = vector.extract_strided_slice %290 {offsets = [0, 0], sizes = [8, 16], strides = [1, 1]} : vector<8x128xf32> to vector<8x16xf32>
    %295 = vector.extract_strided_slice %293 {offsets = [0, 0], sizes = [8, 16], strides = [1, 1]} : vector<8x128xf32> to vector<8x16xf32>
    %296 = arith.addf %294, %295 : vector<8x16xf32>
    %297 = arith.negf %296 : vector<8x16xf32>
    %298 = math.exp %297 : vector<8x16xf32>
    %cst_68 = arith.constant 1.000000e+00 : f32
    %299 = vector.broadcast %cst_68 : f32 to vector<8x16xf32>
    %300 = arith.addf %299, %298 : vector<8x16xf32>
    %301 = arith.divf %299, %300 : vector<8x16xf32>
    %302 = vector.extract_strided_slice %290 {offsets = [0, 16], sizes = [8, 16], strides = [1, 1]} : vector<8x128xf32> to vector<8x16xf32>
    %303 = vector.extract_strided_slice %293 {offsets = [0, 16], sizes = [8, 16], strides = [1, 1]} : vector<8x128xf32> to vector<8x16xf32>
    %304 = arith.addf %302, %303 : vector<8x16xf32>
    %305 = arith.negf %304 : vector<8x16xf32>
    %306 = math.exp %305 : vector<8x16xf32>
    %cst_69 = arith.constant 1.000000e+00 : f32
    %307 = vector.broadcast %cst_69 : f32 to vector<8x16xf32>
    %308 = arith.addf %307, %306 : vector<8x16xf32>
    %309 = arith.divf %307, %308 : vector<8x16xf32>
    %310 = vector.extract_strided_slice %290 {offsets = [0, 32], sizes = [8, 16], strides = [1, 1]} : vector<8x128xf32> to vector<8x16xf32>
    %311 = vector.extract_strided_slice %293 {offsets = [0, 32], sizes = [8, 16], strides = [1, 1]} : vector<8x128xf32> to vector<8x16xf32>
    %312 = arith.mulf %301, %311 : vector<8x16xf32>
    %313 = arith.addf %310, %312 : vector<8x16xf32>
    %314 = math.tanh %313 : vector<8x16xf32>
    %cst_70 = arith.constant 1.000000e+00 : f32
    %315 = vector.broadcast %cst_70 : f32 to vector<8x16xf32>
    %316 = arith.subf %315, %309 : vector<8x16xf32>
    %317 = arith.mulf %316, %314 : vector<8x16xf32>
    %318 = arith.mulf %309, %288 : vector<8x16xf32>
    %319 = arith.addf %317, %318 : vector<8x16xf32>
    %c8_71 = arith.constant 8 : index
    %c0_72 = arith.constant 0 : index
    %320 = vector.load %arg9[%c8_71, %c0_72] : memref<64x16xf32, #tpu.memory_space<vmem>>, vector<8x16xf32>
    tpu.vector_store %arg9[%c8_71, %c0_72], %319 {strides = array<i32>} : memref<64x16xf32, #tpu.memory_space<vmem>>, vector<8x16xf32>,
    %c16_73 = arith.constant 16 : index
    %c128_74 = arith.constant 128 : index
    %321 = vector.load %arg8[%c16_73, %c128_74] : memref<72x256xf32, #tpu.memory_space<vmem>>, vector<8x128xf32>
    %cst_75 = arith.constant dense<0.000000e+00> : vector<8x128xf32>
    %322 = tpu.matmul %319, %257, %cst_75 {dimension_numbers = #tpu.dot_dimension_numbers<[1], [0], [0], [1], [0, 0, 1, 1], [], []>} : vector<8x16xf32>, vector<16x128xf32>, vector<8x128xf32> -> vector<8x128xf32>
    %323 = vector.broadcast %258 : vector<1x128xf32> to vector<8x128xf32>
    %324 = arith.addf %322, %323 : vector<8x128xf32>
    %325 = vector.extract_strided_slice %321 {offsets = [0, 0], sizes = [8, 16], strides = [1, 1]} : vector<8x128xf32> to vector<8x16xf32>
    %326 = vector.extract_strided_slice %324 {offsets = [0, 0], sizes = [8, 16], strides = [1, 1]} : vector<8x128xf32> to vector<8x16xf32>
    %327 = arith.addf %325, %326 : vector<8x16xf32>
    %328 = arith.negf %327 : vector<8x16xf32>
    %329 = math.exp %328 : vector<8x16xf32>
    %cst_76 = arith.constant 1.000000e+00 : f32
    %330 = vector.broadcast %cst_76 : f32 to vector<8x16xf32>
    %331 = arith.addf %330, %329 : vector<8x16xf32>
    %332 = arith.divf %330, %331 : vector<8x16xf32>
    %333 = vector.extract_strided_slice %321 {offsets = [0, 16], sizes = [8, 16], strides = [1, 1]} : vector<8x128xf32> to vector<8x16xf32>
    %334 = vector.extract_strided_slice %324 {offsets = [0, 16], sizes = [8, 16], strides = [1, 1]} : vector<8x128xf32> to vector<8x16xf32>
    %335 = arith.addf %333, %334 : vector<8x16xf32>
    %336 = arith.negf %335 : vector<8x16xf32>
    %337 = math.exp %336 : vector<8x16xf32>
    %cst_77 = arith.constant 1.000000e+00 : f32
    %338 = vector.broadcast %cst_77 : f32 to vector<8x16xf32>
    %339 = arith.addf %338, %337 : vector<8x16xf32>
    %340 = arith.divf %338, %339 : vector<8x16xf32>
    %341 = vector.extract_strided_slice %321 {offsets = [0, 32], sizes = [8, 16], strides = [1, 1]} : vector<8x128xf32> to vector<8x16xf32>
    %342 = vector.extract_strided_slice %324 {offsets = [0, 32], sizes = [8, 16], strides = [1, 1]} : vector<8x128xf32> to vector<8x16xf32>
    %343 = arith.mulf %332, %342 : vector<8x16xf32>
    %344 = arith.addf %341, %343 : vector<8x16xf32>
    %345 = math.tanh %344 : vector<8x16xf32>
    %cst_78 = arith.constant 1.000000e+00 : f32
    %346 = vector.broadcast %cst_78 : f32 to vector<8x16xf32>
    %347 = arith.subf %346, %340 : vector<8x16xf32>
    %348 = arith.mulf %347, %345 : vector<8x16xf32>
    %349 = arith.mulf %340, %319 : vector<8x16xf32>
    %350 = arith.addf %348, %349 : vector<8x16xf32>
    %c16_79 = arith.constant 16 : index
    %c0_80 = arith.constant 0 : index
    %351 = vector.load %arg9[%c16_79, %c0_80] : memref<64x16xf32, #tpu.memory_space<vmem>>, vector<8x16xf32>
    tpu.vector_store %arg9[%c16_79, %c0_80], %350 {strides = array<i32>} : memref<64x16xf32, #tpu.memory_space<vmem>>, vector<8x16xf32>,
    %c24_81 = arith.constant 24 : index
    %c128_82 = arith.constant 128 : index
    %352 = vector.load %arg8[%c24_81, %c128_82] : memref<72x256xf32, #tpu.memory_space<vmem>>, vector<8x128xf32>
    %cst_83 = arith.constant dense<0.000000e+00> : vector<8x128xf32>
    %353 = tpu.matmul %350, %257, %cst_83 {dimension_numbers = #tpu.dot_dimension_numbers<[1], [0], [0], [1], [0, 0, 1, 1], [], []>} : vector<8x16xf32>, vector<16x128xf32>, vector<8x128xf32> -> vector<8x128xf32>
    %354 = vector.broadcast %258 : vector<1x128xf32> to vector<8x128xf32>
    %355 = arith.addf %353, %354 : vector<8x128xf32>
    %356 = vector.extract_strided_slice %352 {offsets = [0, 0], sizes = [8, 16], strides = [1, 1]} : vector<8x128xf32> to vector<8x16xf32>
    %357 = vector.extract_strided_slice %355 {offsets = [0, 0], sizes = [8, 16], strides = [1, 1]} : vector<8x128xf32> to vector<8x16xf32>
    %358 = arith.addf %356, %357 : vector<8x16xf32>
    %359 = arith.negf %358 : vector<8x16xf32>
    %360 = math.exp %359 : vector<8x16xf32>
    %cst_84 = arith.constant 1.000000e+00 : f32
    %361 = vector.broadcast %cst_84 : f32 to vector<8x16xf32>
    %362 = arith.addf %361, %360 : vector<8x16xf32>
    %363 = arith.divf %361, %362 : vector<8x16xf32>
    %364 = vector.extract_strided_slice %352 {offsets = [0, 16], sizes = [8, 16], strides = [1, 1]} : vector<8x128xf32> to vector<8x16xf32>
    %365 = vector.extract_strided_slice %355 {offsets = [0, 16], sizes = [8, 16], strides = [1, 1]} : vector<8x128xf32> to vector<8x16xf32>
    %366 = arith.addf %364, %365 : vector<8x16xf32>
    %367 = arith.negf %366 : vector<8x16xf32>
    %368 = math.exp %367 : vector<8x16xf32>
    %cst_85 = arith.constant 1.000000e+00 : f32
    %369 = vector.broadcast %cst_85 : f32 to vector<8x16xf32>
    %370 = arith.addf %369, %368 : vector<8x16xf32>
    %371 = arith.divf %369, %370 : vector<8x16xf32>
    %372 = vector.extract_strided_slice %352 {offsets = [0, 32], sizes = [8, 16], strides = [1, 1]} : vector<8x128xf32> to vector<8x16xf32>
    %373 = vector.extract_strided_slice %355 {offsets = [0, 32], sizes = [8, 16], strides = [1, 1]} : vector<8x128xf32> to vector<8x16xf32>
    %374 = arith.mulf %363, %373 : vector<8x16xf32>
    %375 = arith.addf %372, %374 : vector<8x16xf32>
    %376 = math.tanh %375 : vector<8x16xf32>
    %cst_86 = arith.constant 1.000000e+00 : f32
    %377 = vector.broadcast %cst_86 : f32 to vector<8x16xf32>
    %378 = arith.subf %377, %371 : vector<8x16xf32>
    %379 = arith.mulf %378, %376 : vector<8x16xf32>
    %380 = arith.mulf %371, %350 : vector<8x16xf32>
    %381 = arith.addf %379, %380 : vector<8x16xf32>
    %c24_87 = arith.constant 24 : index
    %c0_88 = arith.constant 0 : index
    %382 = vector.load %arg9[%c24_87, %c0_88] : memref<64x16xf32, #tpu.memory_space<vmem>>, vector<8x16xf32>
    tpu.vector_store %arg9[%c24_87, %c0_88], %381 {strides = array<i32>} : memref<64x16xf32, #tpu.memory_space<vmem>>, vector<8x16xf32>,
    %c32_89 = arith.constant 32 : index
    %c128_90 = arith.constant 128 : index
    %383 = vector.load %arg8[%c32_89, %c128_90] : memref<72x256xf32, #tpu.memory_space<vmem>>, vector<8x128xf32>
    %cst_91 = arith.constant dense<0.000000e+00> : vector<8x128xf32>
    %384 = tpu.matmul %381, %257, %cst_91 {dimension_numbers = #tpu.dot_dimension_numbers<[1], [0], [0], [1], [0, 0, 1, 1], [], []>} : vector<8x16xf32>, vector<16x128xf32>, vector<8x128xf32> -> vector<8x128xf32>
    %385 = vector.broadcast %258 : vector<1x128xf32> to vector<8x128xf32>
    %386 = arith.addf %384, %385 : vector<8x128xf32>
    %387 = vector.extract_strided_slice %383 {offsets = [0, 0], sizes = [8, 16], strides = [1, 1]} : vector<8x128xf32> to vector<8x16xf32>
    %388 = vector.extract_strided_slice %386 {offsets = [0, 0], sizes = [8, 16], strides = [1, 1]} : vector<8x128xf32> to vector<8x16xf32>
    %389 = arith.addf %387, %388 : vector<8x16xf32>
    %390 = arith.negf %389 : vector<8x16xf32>
    %391 = math.exp %390 : vector<8x16xf32>
    %cst_92 = arith.constant 1.000000e+00 : f32
    %392 = vector.broadcast %cst_92 : f32 to vector<8x16xf32>
    %393 = arith.addf %392, %391 : vector<8x16xf32>
    %394 = arith.divf %392, %393 : vector<8x16xf32>
    %395 = vector.extract_strided_slice %383 {offsets = [0, 16], sizes = [8, 16], strides = [1, 1]} : vector<8x128xf32> to vector<8x16xf32>
    %396 = vector.extract_strided_slice %386 {offsets = [0, 16], sizes = [8, 16], strides = [1, 1]} : vector<8x128xf32> to vector<8x16xf32>
    %397 = arith.addf %395, %396 : vector<8x16xf32>
    %398 = arith.negf %397 : vector<8x16xf32>
    %399 = math.exp %398 : vector<8x16xf32>
    %cst_93 = arith.constant 1.000000e+00 : f32
    %400 = vector.broadcast %cst_93 : f32 to vector<8x16xf32>
    %401 = arith.addf %400, %399 : vector<8x16xf32>
    %402 = arith.divf %400, %401 : vector<8x16xf32>
    %403 = vector.extract_strided_slice %383 {offsets = [0, 32], sizes = [8, 16], strides = [1, 1]} : vector<8x128xf32> to vector<8x16xf32>
    %404 = vector.extract_strided_slice %386 {offsets = [0, 32], sizes = [8, 16], strides = [1, 1]} : vector<8x128xf32> to vector<8x16xf32>
    %405 = arith.mulf %394, %404 : vector<8x16xf32>
    %406 = arith.addf %403, %405 : vector<8x16xf32>
    %407 = math.tanh %406 : vector<8x16xf32>
    %cst_94 = arith.constant 1.000000e+00 : f32
    %408 = vector.broadcast %cst_94 : f32 to vector<8x16xf32>
    %409 = arith.subf %408, %402 : vector<8x16xf32>
    %410 = arith.mulf %409, %407 : vector<8x16xf32>
    %411 = arith.mulf %402, %381 : vector<8x16xf32>
    %412 = arith.addf %410, %411 : vector<8x16xf32>
    %c32_95 = arith.constant 32 : index
    %c0_96 = arith.constant 0 : index
    %413 = vector.load %arg9[%c32_95, %c0_96] : memref<64x16xf32, #tpu.memory_space<vmem>>, vector<8x16xf32>
    tpu.vector_store %arg9[%c32_95, %c0_96], %412 {strides = array<i32>} : memref<64x16xf32, #tpu.memory_space<vmem>>, vector<8x16xf32>,
    %c40_97 = arith.constant 40 : index
    %c128_98 = arith.constant 128 : index
    %414 = vector.load %arg8[%c40_97, %c128_98] : memref<72x256xf32, #tpu.memory_space<vmem>>, vector<8x128xf32>
    %cst_99 = arith.constant dense<0.000000e+00> : vector<8x128xf32>
    %415 = tpu.matmul %412, %257, %cst_99 {dimension_numbers = #tpu.dot_dimension_numbers<[1], [0], [0], [1], [0, 0, 1, 1], [], []>} : vector<8x16xf32>, vector<16x128xf32>, vector<8x128xf32> -> vector<8x128xf32>
    %416 = vector.broadcast %258 : vector<1x128xf32> to vector<8x128xf32>
    %417 = arith.addf %415, %416 : vector<8x128xf32>
    %418 = vector.extract_strided_slice %414 {offsets = [0, 0], sizes = [8, 16], strides = [1, 1]} : vector<8x128xf32> to vector<8x16xf32>
    %419 = vector.extract_strided_slice %417 {offsets = [0, 0], sizes = [8, 16], strides = [1, 1]} : vector<8x128xf32> to vector<8x16xf32>
    %420 = arith.addf %418, %419 : vector<8x16xf32>
    %421 = arith.negf %420 : vector<8x16xf32>
    %422 = math.exp %421 : vector<8x16xf32>
    %cst_100 = arith.constant 1.000000e+00 : f32
    %423 = vector.broadcast %cst_100 : f32 to vector<8x16xf32>
    %424 = arith.addf %423, %422 : vector<8x16xf32>
    %425 = arith.divf %423, %424 : vector<8x16xf32>
    %426 = vector.extract_strided_slice %414 {offsets = [0, 16], sizes = [8, 16], strides = [1, 1]} : vector<8x128xf32> to vector<8x16xf32>
    %427 = vector.extract_strided_slice %417 {offsets = [0, 16], sizes = [8, 16], strides = [1, 1]} : vector<8x128xf32> to vector<8x16xf32>
    %428 = arith.addf %426, %427 : vector<8x16xf32>
    %429 = arith.negf %428 : vector<8x16xf32>
    %430 = math.exp %429 : vector<8x16xf32>
    %cst_101 = arith.constant 1.000000e+00 : f32
    %431 = vector.broadcast %cst_101 : f32 to vector<8x16xf32>
    %432 = arith.addf %431, %430 : vector<8x16xf32>
    %433 = arith.divf %431, %432 : vector<8x16xf32>
    %434 = vector.extract_strided_slice %414 {offsets = [0, 32], sizes = [8, 16], strides = [1, 1]} : vector<8x128xf32> to vector<8x16xf32>
    %435 = vector.extract_strided_slice %417 {offsets = [0, 32], sizes = [8, 16], strides = [1, 1]} : vector<8x128xf32> to vector<8x16xf32>
    %436 = arith.mulf %425, %435 : vector<8x16xf32>
    %437 = arith.addf %434, %436 : vector<8x16xf32>
    %438 = math.tanh %437 : vector<8x16xf32>
    %cst_102 = arith.constant 1.000000e+00 : f32
    %439 = vector.broadcast %cst_102 : f32 to vector<8x16xf32>
    %440 = arith.subf %439, %433 : vector<8x16xf32>
    %441 = arith.mulf %440, %438 : vector<8x16xf32>
    %442 = arith.mulf %433, %412 : vector<8x16xf32>
    %443 = arith.addf %441, %442 : vector<8x16xf32>
    %c40_103 = arith.constant 40 : index
    %c0_104 = arith.constant 0 : index
    %444 = vector.load %arg9[%c40_103, %c0_104] : memref<64x16xf32, #tpu.memory_space<vmem>>, vector<8x16xf32>
    tpu.vector_store %arg9[%c40_103, %c0_104], %443 {strides = array<i32>} : memref<64x16xf32, #tpu.memory_space<vmem>>, vector<8x16xf32>,
    %c48_105 = arith.constant 48 : index
    %c128_106 = arith.constant 128 : index
    %445 = vector.load %arg8[%c48_105, %c128_106] : memref<72x256xf32, #tpu.memory_space<vmem>>, vector<8x128xf32>
    %cst_107 = arith.constant dense<0.000000e+00> : vector<8x128xf32>
    %446 = tpu.matmul %443, %257, %cst_107 {dimension_numbers = #tpu.dot_dimension_numbers<[1], [0], [0], [1], [0, 0, 1, 1], [], []>} : vector<8x16xf32>, vector<16x128xf32>, vector<8x128xf32> -> vector<8x128xf32>
    %447 = vector.broadcast %258 : vector<1x128xf32> to vector<8x128xf32>
    %448 = arith.addf %446, %447 : vector<8x128xf32>
    %449 = vector.extract_strided_slice %445 {offsets = [0, 0], sizes = [8, 16], strides = [1, 1]} : vector<8x128xf32> to vector<8x16xf32>
    %450 = vector.extract_strided_slice %448 {offsets = [0, 0], sizes = [8, 16], strides = [1, 1]} : vector<8x128xf32> to vector<8x16xf32>
    %451 = arith.addf %449, %450 : vector<8x16xf32>
    %452 = arith.negf %451 : vector<8x16xf32>
    %453 = math.exp %452 : vector<8x16xf32>
    %cst_108 = arith.constant 1.000000e+00 : f32
    %454 = vector.broadcast %cst_108 : f32 to vector<8x16xf32>
    %455 = arith.addf %454, %453 : vector<8x16xf32>
    %456 = arith.divf %454, %455 : vector<8x16xf32>
    %457 = vector.extract_strided_slice %445 {offsets = [0, 16], sizes = [8, 16], strides = [1, 1]} : vector<8x128xf32> to vector<8x16xf32>
    %458 = vector.extract_strided_slice %448 {offsets = [0, 16], sizes = [8, 16], strides = [1, 1]} : vector<8x128xf32> to vector<8x16xf32>
    %459 = arith.addf %457, %458 : vector<8x16xf32>
    %460 = arith.negf %459 : vector<8x16xf32>
    %461 = math.exp %460 : vector<8x16xf32>
    %cst_109 = arith.constant 1.000000e+00 : f32
    %462 = vector.broadcast %cst_109 : f32 to vector<8x16xf32>
    %463 = arith.addf %462, %461 : vector<8x16xf32>
    %464 = arith.divf %462, %463 : vector<8x16xf32>
    %465 = vector.extract_strided_slice %445 {offsets = [0, 32], sizes = [8, 16], strides = [1, 1]} : vector<8x128xf32> to vector<8x16xf32>
    %466 = vector.extract_strided_slice %448 {offsets = [0, 32], sizes = [8, 16], strides = [1, 1]} : vector<8x128xf32> to vector<8x16xf32>
    %467 = arith.mulf %456, %466 : vector<8x16xf32>
    %468 = arith.addf %465, %467 : vector<8x16xf32>
    %469 = math.tanh %468 : vector<8x16xf32>
    %cst_110 = arith.constant 1.000000e+00 : f32
    %470 = vector.broadcast %cst_110 : f32 to vector<8x16xf32>
    %471 = arith.subf %470, %464 : vector<8x16xf32>
    %472 = arith.mulf %471, %469 : vector<8x16xf32>
    %473 = arith.mulf %464, %443 : vector<8x16xf32>
    %474 = arith.addf %472, %473 : vector<8x16xf32>
    %c48_111 = arith.constant 48 : index
    %c0_112 = arith.constant 0 : index
    %475 = vector.load %arg9[%c48_111, %c0_112] : memref<64x16xf32, #tpu.memory_space<vmem>>, vector<8x16xf32>
    tpu.vector_store %arg9[%c48_111, %c0_112], %474 {strides = array<i32>} : memref<64x16xf32, #tpu.memory_space<vmem>>, vector<8x16xf32>,
    %c56_113 = arith.constant 56 : index
    %c128_114 = arith.constant 128 : index
    %476 = vector.load %arg8[%c56_113, %c128_114] : memref<72x256xf32, #tpu.memory_space<vmem>>, vector<8x128xf32>
    %cst_115 = arith.constant dense<0.000000e+00> : vector<8x128xf32>
    %477 = tpu.matmul %474, %257, %cst_115 {dimension_numbers = #tpu.dot_dimension_numbers<[1], [0], [0], [1], [0, 0, 1, 1], [], []>} : vector<8x16xf32>, vector<16x128xf32>, vector<8x128xf32> -> vector<8x128xf32>
    %478 = vector.broadcast %258 : vector<1x128xf32> to vector<8x128xf32>
    %479 = arith.addf %477, %478 : vector<8x128xf32>
    %480 = vector.extract_strided_slice %476 {offsets = [0, 0], sizes = [8, 16], strides = [1, 1]} : vector<8x128xf32> to vector<8x16xf32>
    %481 = vector.extract_strided_slice %479 {offsets = [0, 0], sizes = [8, 16], strides = [1, 1]} : vector<8x128xf32> to vector<8x16xf32>
    %482 = arith.addf %480, %481 : vector<8x16xf32>
    %483 = arith.negf %482 : vector<8x16xf32>
    %484 = math.exp %483 : vector<8x16xf32>
    %cst_116 = arith.constant 1.000000e+00 : f32
    %485 = vector.broadcast %cst_116 : f32 to vector<8x16xf32>
    %486 = arith.addf %485, %484 : vector<8x16xf32>
    %487 = arith.divf %485, %486 : vector<8x16xf32>
    %488 = vector.extract_strided_slice %476 {offsets = [0, 16], sizes = [8, 16], strides = [1, 1]} : vector<8x128xf32> to vector<8x16xf32>
    %489 = vector.extract_strided_slice %479 {offsets = [0, 16], sizes = [8, 16], strides = [1, 1]} : vector<8x128xf32> to vector<8x16xf32>
    %490 = arith.addf %488, %489 : vector<8x16xf32>
    %491 = arith.negf %490 : vector<8x16xf32>
    %492 = math.exp %491 : vector<8x16xf32>
    %cst_117 = arith.constant 1.000000e+00 : f32
    %493 = vector.broadcast %cst_117 : f32 to vector<8x16xf32>
    %494 = arith.addf %493, %492 : vector<8x16xf32>
    %495 = arith.divf %493, %494 : vector<8x16xf32>
    %496 = vector.extract_strided_slice %476 {offsets = [0, 32], sizes = [8, 16], strides = [1, 1]} : vector<8x128xf32> to vector<8x16xf32>
    %497 = vector.extract_strided_slice %479 {offsets = [0, 32], sizes = [8, 16], strides = [1, 1]} : vector<8x128xf32> to vector<8x16xf32>
    %498 = arith.mulf %487, %497 : vector<8x16xf32>
    %499 = arith.addf %496, %498 : vector<8x16xf32>
    %500 = math.tanh %499 : vector<8x16xf32>
    %cst_118 = arith.constant 1.000000e+00 : f32
    %501 = vector.broadcast %cst_118 : f32 to vector<8x16xf32>
    %502 = arith.subf %501, %495 : vector<8x16xf32>
    %503 = arith.mulf %502, %500 : vector<8x16xf32>
    %504 = arith.mulf %495, %474 : vector<8x16xf32>
    %505 = arith.addf %503, %504 : vector<8x16xf32>
    %c56_119 = arith.constant 56 : index
    %c0_120 = arith.constant 0 : index
    %506 = vector.load %arg9[%c56_119, %c0_120] : memref<64x16xf32, #tpu.memory_space<vmem>>, vector<8x16xf32>
    tpu.vector_store %arg9[%c56_119, %c0_120], %505 {strides = array<i32>} : memref<64x16xf32, #tpu.memory_space<vmem>>, vector<8x16xf32>,
    %c0_121 = arith.constant 0 : index
    %c0_122 = arith.constant 0 : index
    %507 = vector.load %arg9[%c0_121, %c0_122] : memref<64x16xf32, #tpu.memory_space<vmem>>, vector<64x16xf32>
    %c0_123 = arith.constant 0 : index
    %c128_124 = arith.constant 128 : index
    %508 = vector.load %arg4[%c0_123, %c128_124] : memref<16x256xf32, #tpu.memory_space<vmem>>, vector<16x128xf32>
    %cst_125 = arith.constant dense<0.000000e+00> : vector<64x128xf32>
    %509 = tpu.matmul %507, %508, %cst_125 {dimension_numbers = #tpu.dot_dimension_numbers<[1], [0], [0], [1], [0, 0, 1, 1], [], []>} : vector<64x16xf32>, vector<16x128xf32>, vector<64x128xf32> -> vector<64x128xf32>
    %c0_126 = arith.constant 0 : index
    %c640 = arith.constant 640 : index
    %510 = vector.load %arg5[%c0_126, %c640] : memref<1x768xf32, #tpu.memory_space<vmem>>, vector<1x128xf32>
    %511 = vector.broadcast %510 : vector<1x128xf32> to vector<64x128xf32>
    %512 = arith.addf %509, %511 : vector<64x128xf32>
    %c8_127 = arith.constant 8 : index
    %c0_128 = arith.constant 0 : index
    %513 = vector.load %arg0[%c8_127, %c0_128] : memref<72x128xf32, #tpu.memory_space<vmem>>, vector<64x128xf32>
    %514 = arith.subf %513, %512 : vector<64x128xf32>
    %515 = arith.mulf %514, %514 : vector<64x128xf32>
    %cst_129 = arith.constant dense<0.000000e+00> : vector<64xf32>
    %516 = vector.multi_reduction <add>, %515, %cst_129 [1] : vector<64x128xf32> to vector<64xf32>
    %517 = vector.shape_cast %516 : vector<64xf32> to vector<64x1xf32>
    %c0_130 = arith.constant 0 : index
    %c0_131 = arith.constant 0 : index
    %518 = vector.load %arg1[%c0_130, %c0_131] : memref<64x1xf32, #tpu.memory_space<vmem>>, vector<64x1xf32>
    %519 = arith.mulf %517, %518 : vector<64x1xf32>
    %520 = vector.shape_cast %519 : vector<64x1xf32> to vector<1x64x1xf32>
    %cst_132 = arith.constant dense<0.000000e+00> : vector<1xf32>
    %521 = vector.multi_reduction <add>, %520, %cst_132 [1, 2] : vector<1x64x1xf32> to vector<1xf32>
    %522 = vector.shape_cast %521 : vector<1xf32> to vector<1x1x1xf32>
    %523 = vector.extract %522[0, 0, 0] : f32 from vector<1x1x1xf32>
    %cst_133 = arith.constant 0.001953125 : f32
    %524 = arith.mulf %523, %cst_133 : f32
    %c0_134 = arith.constant 0 : index
    %c0_135 = arith.constant 0 : index
    %525 = vector.load %arg1[%c0_134, %c0_135] : memref<64x1xf32, #tpu.memory_space<vmem>>, vector<8x1xf32>
    %cst_136 = arith.constant 1.000000e+00 : f32
    %526 = vector.broadcast %cst_136 : f32 to vector<8x16xf32>
    %527 = arith.addf %526, %256 : vector<8x16xf32>
    %528 = arith.mulf %255, %255 : vector<8x16xf32>
    %529 = arith.subf %527, %528 : vector<8x16xf32>
    %530 = math.exp %256 : vector<8x16xf32>
    %531 = arith.subf %529, %530 : vector<8x16xf32>
    %532 = vector.broadcast %525 : vector<8x1xf32> to vector<8x16xf32>
    %533 = arith.mulf %531, %532 : vector<8x16xf32>
    %534 = vector.shape_cast %533 : vector<8x16xf32> to vector<1x8x16xf32>
    %cst_137 = arith.constant dense<0.000000e+00> : vector<1xf32>
    %535 = vector.multi_reduction <add>, %534, %cst_137 [1, 2] : vector<1x8x16xf32> to vector<1xf32>
    %536 = vector.shape_cast %535 : vector<1xf32> to vector<1x1x1xf32>
    %537 = vector.extract %536[0, 0, 0] : f32 from vector<1x1x1xf32>
    %cst_138 = arith.constant 5.000000e-01 : f32
    %538 = arith.mulf %cst_138, %537 : f32
    %cst_139 = arith.constant 1.562500e-02 : f32
    %539 = arith.mulf %538, %cst_139 : f32
    %cst_140 = arith.constant 1.000000e-01 : f32
    %cst_141 = arith.constant 4.000000e+00 : f32
    %540 = arith.mulf %cst_140, %cst_141 : f32
    %cst_142 = arith.constant 1.000000e-01 : f32
    %541 = arith.mulf %cst_142, %539 : f32
    %542 = arith.subf %524, %541 : f32
    %543 = arith.mulf %540, %542 : f32
    %c0_143 = arith.constant 0 : index
    %c0_144 = arith.constant 0 : index
    %544 = memref.load %arg6[%c0_143, %c0_144] : memref<1x1xf32, #tpu.memory_space<smem>>
    memref.store %543, %arg6[%c0_143, %c0_144] : memref<1x1xf32, #tpu.memory_space<smem>>
    %c0_145 = arith.constant 0 : index
    %c0_146 = arith.constant 0 : index
    %545 = vector.load %arg7[%c0_145, %c0_146] : memref<8x32xf32, #tpu.memory_space<vmem>>, vector<8x32xf32>
    tpu.vector_store %arg7[%c0_145, %c0_146], %249 {strides = array<i32>} : memref<8x32xf32, #tpu.memory_space<vmem>>, vector<8x32xf32>,
    return
  }
}

</mosaic_0001>

<bundles_post_ra>
// kernel: tpu_custom_call.1
= control target key start
LH: loop header
LB: loop body
LE: loop exit
PB: predicated region body
PF: predicated region fallthrough
CT: control target
= control target key end

     0   :  { %13 = vsyncpa [#allocation5], 0  ;;  %s3315_s0 = inlined_call_operand.hbm [shape: f32[72,128], index: 0, kind: input, shape index: {}]   ;;  %s3316_s1 = inlined_call_operand.vmem [shape: f32[64,1], index: 1, kind: input, shape index: {}]   ;;  %s3317_s2 = inlined_call_operand.hbm [shape: f32[128,256], index: 2, kind: input, shape index: {}]   ;;  %s3318_s3 = inlined_call_operand.vmem [shape: f32[32,256], index: 3, kind: input, shape index: {}]   ;;  %s3319_s4 = inlined_call_operand.hbm [shape: f32[16,256], index: 4, kind: input, shape index: {}]   ;;  %s3320_s5 = inlined_call_operand.vmem [shape: f32[1,768], index: 5, kind: input, shape index: {}]   ;;  %s3321_s6 = inlined_call_operand.hbm [shape: f32[1,1], index: 6, kind: output, shape index: {0}]   ;;  %s3322_s7 = inlined_call_operand.hbm [shape: f32[8,32], index: 7, kind: output, shape index: {1}]  }
   0x1   :  { %14 = vsyncpa [#allocation9], 0 }
   0x2   :  { %15 = vsyncpa [#allocation7], 0 }
   0x3   :  { %16 = vsyncpa [#allocation6], 0  ;;  %s2822_s24 = smov [#allocation8]  }
   0x4   :  { %s36_s25 = sshll.u32 %s2822_s24, 4  ;;  %s37_s25 = int_to_ptr.vmem [resolvable:$true] %s36_s25 }
   0x5   :  { %s2734_s26 = scalar_lea.vmem %s37_s25, 4096  ;;  %p2739_p1 = scmp.lt.s32.totalorder %s37_s25, %s37_s25 }
   0x6   :  { %p2735_p0 = scmp.ne.s32.totalorder %s37_s25, %s2734_s26  ;;  %p2740_p2 = scmp.lt.s32.totalorder %s2734_s26, %s2734_s26 }
   0x8   :  { %p2741_p3 = por %p2740_p2, %p2739_p1 }
   0xa   :  { %p2742_p4 = pnand %p2741_p3, %p2735_p0 }
   0xc   :  { %2745 = shalt.err (!%p2742_p4)
}
   0xd   :  { %s2823_s27 = smov 256   ;;  %s2824_s28 = smov 16  }
   0xe   :  { %42 = dma.hbm_to_vmem [thread:$0]  %s3317_s2, 4096, %s37_s25, [#allocation9], %s2823_s27, %s2823_s27, %s2824_s28  }
   0xf   :  { %s2825_s8 = smov [#allocation4]  }
  0x10   :  { %s22_s9 = sshll.u32 %s2825_s8, 4  ;;  %s23_s9 = int_to_ptr.vmem [resolvable:$true] %s22_s9 }
  0x11   :  { %s2754_s10 = scalar_lea.vmem %s23_s9, 1152  ;;  %p2759_p6 = scmp.lt.s32.totalorder %s23_s9, %s23_s9 }
  0x12   :  { %p2755_p5 = scmp.ne.s32.totalorder %s23_s9, %s2754_s10  ;;  %p2760_p7 = scmp.lt.s32.totalorder %s2754_s10, %s2754_s10 }
  0x14   :  { %p2761_p8 = por %p2760_p7, %p2759_p6 }
  0x16   :  { %p2762_p9 = pnand %p2761_p8, %p2755_p5 }
  0x18   :  { %2765 = shalt.err (!%p2762_p9)
}
  0x19   :  { %s2826_s11 = smov 128   ;;  %s2827_s12 = smov 8  }
  0x1a   :  { %28 = dma.hbm_to_vmem [thread:$0]  %s3315_s0, 1152, %s23_s9, [#allocation5], %s2826_s11, %s2826_s11, %s2827_s12  }
  0x1b   :  { %s2828_s15 = smov [#allocation10]  }
  0x1c   :  { %s50_s16 = sshll.u32 %s2828_s15, 4  ;;  %s51_s16 = int_to_ptr.vmem [resolvable:$true] %s50_s16 }
  0x1d   :  { %s2774_s2 = scalar_lea.vmem %s51_s16, 512  ;;  %p2779_p11 = scmp.lt.s32.totalorder %s51_s16, %s51_s16 }
  0x1e   :  { %p2775_p10 = scmp.ne.s32.totalorder %s51_s16, %s2774_s2  ;;  %p2780_p12 = scmp.lt.s32.totalorder %s2774_s2, %s2774_s2 }
  0x20   :  { %p2781_p13 = por %p2780_p12, %p2779_p11 }
  0x22   :  { %p2782_p0 = pnand %p2781_p13, %p2775_p10 }
  0x24   :  { %2785 = shalt.err (!%p2782_p0)
}
  0x25   :  { %56 = dma.hbm_to_vmem [thread:$0]  %s3319_s4, 512, %s51_s16, [#allocation9], %s2823_s27, %s2823_s27, %s2824_s28  }
  0x26   :  { %2814 = dma.done.wait [#allocation5], 1152  }
  0x27   :  { %2815 = vsyncadd [#allocation5], 4294966144 }
  0x28   :  { %2816 = dma.done.wait [#allocation9], 4608  }
  0x29   :  { %2817 = vsyncadd [#allocation9], 4294962688  ;;  %v2829_v0 = vmov 0.0   ;;  %vm2830_vm0 = vmmov 0   ;;  %v108_v1 = vld [vmem:[#allocation8 + $0xf8] sm:$0xff]  ;;  %v107_v2 = vld [vmem:[#allocation8 + $0xf0] sm:$0xff]  ;;  %v111_v46 = vlaneseq }
  0x2a   :  { %185 = vmatprep.mubr.f32.mxu0 %v2829_v0  ;;  %2446 = vmatprep.subr.mxu1 %v2829_v0  ;;  %v106_v3 = vld [vmem:[#allocation8 + $0xe8] sm:$0xff]  ;;  %v105_v4 = vld [vmem:[#allocation8 + $0xe0] sm:$0xff]  ;;  %v104_v5 = vld [vmem:[#allocation8 + $0xd8] sm:$0xff]  ;;  %s2831_s30 = smov 64   ;;  %s2832_s8 = smov 96   ;;  %vm270_vm1 = vcmask 261120  }
  0x2b   :  { %2454 = vmatprep.mubr.msk.f32.mxu1 %vm2830_vm0, %v2829_v0  ;;  %121 = vmatprep.subr.mxu0 %v108_v1  ;;  %v103_v6 = vld [vmem:[#allocation8 + $0xd0] sm:$0xff]  ;;  %v102_v7 = vld [vmem:[#allocation8 + $0xc8] sm:$0xff]  ;;  %v101_v8 = vld [vmem:[#allocation8 + $0xc0] sm:$0xff]  ;;  %v112_v47 = vshrl.u32 %v111_v46, 7  ;;  %vm1180_vm2 = vcmask 130048   ;;  %s2833_s0 = smov 32  }
  0x2c   :  { %122 = vmatpush1.msra.mxu0 %v107_v2  ;;  %v100_v9 = vld [vmem:[#allocation8 + $0xb8] sm:$0xff]  ;;  %v99_v10 = vld [vmem:[#allocation8 + $0xb0] sm:$0xff]  ;;  %v98_v11 = vld [vmem:[#allocation8 + $0xa8] sm:$0xff]  ;;  %s2834_s4 = smov 112   ;;  %vm2218_vm3 = vcmask 7168   ;;  %s2836_s13 = smov [#allocation12]  }
  0x2d   :  { %123 = vmatprep.subr.mxu0 %v106_v3  ;;  %v97_v12 = vld [vmem:[#allocation8 + $0xa0] sm:$0xff]  ;;  %v96_v13 = vld [vmem:[#allocation8 + $0x98] sm:$0xff]  ;;  %v95_v14 = vld [vmem:[#allocation8 + $0x90] sm:$0xff]  ;;  %v117_v48 = vsub.s32 1, %v112_v47  ;;  %v113_v54 = vsub.s32 0, %v112_v47  ;;  %s2297_s14 = sshll.u32 %s2836_s13, 4  ;;  %s2298_s14 = int_to_ptr.vmem [resolvable:$true] %s2297_s14 }
  0x2e   :  { %124 = vmatpush1.msra.mxu0 %v105_v4  ;;  %v2896_v15 = vld [vmem:[%s3318_s3 + $0x30] sm:$0xff]  ;;  %v93_v17 = vld [vmem:[#allocation8 + $0x80] sm:$0xff]  ;;  %v2902_v18 = vld [vmem:[%s3318_s3 + $0x20] sm:$0xff]  ;;  %p2791_p2 = scmp.lt.s32.totalorder %s2298_s14, %s2298_s14 }
  0x2f   :  { %125 = vmatprep.subr.mxu0 %v104_v5  ;;  %v94_v16 = vld [vmem:[#allocation8 + $0x88] sm:$0xff]  ;;  %2447 = vmatpush3.msra.mxu1 %v2896_v15  ;;  %v92_v19 = vld [vmem:[#allocation8 + $0x78] sm:$0xff]  ;;  %v91_v20 = vld [vmem:[#allocation8 + $0x70] sm:$0xff] }
  0x30   :  { %126 = vmatpush1.msra.mxu0 %v103_v6  ;;  %2448 = vmatprep.subr.mxu1 %v2829_v0  ;;  %v2909_v21 = vld [vmem:[%s3318_s3 + $0x10] sm:$0xff]  ;;  %v89_v23 = vld [vmem:[#allocation8 + $0x60] sm:$0xff]  ;;  %v2916_v24 = vld [vmem:[%s3318_s3] sm:$0xff] }
  0x31   :  { %127 = vmatprep.subr.mxu0 %v102_v7  ;;  %2449 = vmatpush3.msra.mxu1 %v2902_v18  ;;  %v90_v22 = vld [vmem:[#allocation8 + $0x68] sm:$0xff]  ;;  %v88_v25 = vld [vmem:[#allocation8 + $0x58] sm:$0xff]  ;;  %v87_v26 = vld [vmem:[#allocation8 + $0x50] sm:$0xff] }
  0x32   :  { %128 = vmatpush1.msra.mxu0 %v101_v8  ;;  %2450 = vmatprep.subr.mxu1 %v2829_v0  ;;  %v86_v27 = vld [vmem:[#allocation8 + $0x48] sm:$0xff]  ;;  %v85_v28 = vld [vmem:[#allocation8 + $0x40] sm:$0xff]  ;;  %v84_v29 = vld [vmem:[#allocation8 + $0x38] sm:$0xff] }
  0x33   :  { %129 = vmatprep.subr.mxu0 %v100_v9  ;;  %2451 = vmatpush3.msra.mxu1 %v2909_v21  ;;  %v83_v30 = vld [vmem:[#allocation8 + $0x30] sm:$0xff]  ;;  %v82_v31 = vld [vmem:[#allocation8 + $0x28] sm:$0xff]  ;;  %v81_v32 = vld [vmem:[#allocation8 + $0x20] sm:$0xff] }
  0x34   :  { %130 = vmatpush1.msra.mxu0 %v99_v10  ;;  %2452 = vmatprep.subr.mxu1 %v2829_v0  ;;  %v80_v33 = vld [vmem:[#allocation8 + $0x18] sm:$0xff]  ;;  %v79_v34 = vld [vmem:[#allocation8 + $0x10] sm:$0xff]  ;;  %v78_v35 = vld [vmem:[#allocation8 + $0x8] sm:$0xff] }
  0x35   :  { %131 = vmatprep.subr.mxu0 %v98_v11  ;;  %2453 = vmatpush3.msra.mxu1 %v2916_v24  ;;  %v77_v36 = vld [vmem:[#allocation8] sm:$0xff]  ;;  %v68_v37 = vld [vmem:[#allocation4] sm:$0xff]  ;;  %v70_v39 = vld [vmem:[#allocation4 + $0x10] sm:$0xff] }
  0x36   :  { %132 = vmatpush1.msra.mxu0 %v97_v12  ;;  %2457 = vmatprep.subr.mxu1 %v2829_v0  ;;  %v69_v38 = vld [vmem:[#allocation4 + $0x8] sm:$0xff]  ;;  %v71_v40 = vld [vmem:[#allocation4 + $0x18] sm:$0xff]  ;;  %v72_v41 = vld [vmem:[#allocation4 + $0x20] sm:$0xff] }
  0x37   :  { %133 = vmatprep.subr.mxu0 %v96_v13  ;;  %v73_v42 = vld [vmem:[#allocation4 + $0x28] sm:$0xff]  ;;  %v74_v43 = vld [vmem:[#allocation4 + $0x30] sm:$0xff]  ;;  %v75_v44 = vld [vmem:[#allocation4 + $0x38] sm:$0xff] }
  0x38   :  { %134 = vmatpush1.msra.mxu0 %v95_v14  ;;  %v76_v45 = vld [vmem:[#allocation4 + $0x40] sm:$0xff] }
  0x39   :  { %135 = vmatprep.subr.mxu0 %v94_v16  ;;  %v109_v49 = vld [vmem:[%s3320_s5] sm:$0x3] }
  0x3a   :  { %136 = vmatpush1.msra.mxu0 %v93_v17  ;;  %v118_v50 = vrot.slane %v109_v49, %v117_v48  ;;  %v114_v57 = vrot.slane %v109_v49, %v113_v54 }
  0x3b   :  { %137 = vmatprep.subr.mxu0 %v92_v19 }
  0x3c   :  { %138 = vmatpush1.msra.mxu0 %v91_v20 }
  0x3d   :  { %139 = vmatprep.subr.mxu0 %v90_v22 }
  0x3e   :  { %140 = vmatpush1.msra.mxu0 %v89_v23 }
  0x3f   :  { %141 = vmatprep.subr.mxu0 %v88_v25 }
  0x40   :  { %142 = vmatpush1.msra.mxu0 %v87_v26 }
  0x41   :  { %143 = vmatprep.subr.mxu0 %v86_v27  ;;  %v2979_v27 = vld [vmem:[%s3320_s5 + $0x2] ss:$0 sm:$0xff] }
  0x42   :  { %144 = vmatpush1.msra.mxu0 %v85_v28 }
  0x43   :  { %145 = vmatprep.subr.mxu0 %v84_v29 }
  0x44   :  { %146 = vmatpush1.msra.mxu0 %v83_v30 }
  0x45   :  { %147 = vmatprep.subr.mxu0 %v82_v31 }
  0x46   :  { %148 = vmatpush1.msra.mxu0 %v81_v32 }
  0x47   :  { %149 = vmatprep.subr.mxu0 %v80_v33 }
  0x48   :  { %150 = vmatpush1.msra.mxu0 %v79_v34 }
  0x49   :  { %151 = vmatprep.subr.mxu0 %v78_v35 }
  0x4a   :  { %152 = vmatpush1.msra.mxu0 %v77_v36 }
  0x4b   :  { %186 = vmatmul.mubr.f32.vlgmr.msra.gmra.mxu0 %v68_v37  ;;  %2435 = vmatprep.subr.mxu0 %v2829_v0 }
  0x4c   :  { %2436 = vmatpush3.msra.mxu0 %v2896_v15  ;;  %191 = vmatprep.mubr.f32.mxu0 %v2829_v0 }
  0x4d   :  { %2437 = vmatprep.subr.mxu0 %v2829_v0 }
  0x4e   :  { %2438 = vmatpush3.msra.mxu0 %v2902_v18 }
  0x4f   :  { %192 = vmatmul.mubr.f32.gmra.mxu0 %v69_v38  ;;  %2439 = vmatprep.subr.mxu0 %v2829_v0 }
  0x50   :  { %197 = vmatprep.mubr.f32.mxu0 %v2829_v0  ;;  %2440 = vmatpush3.msra.mxu0 %v2909_v21 }
  0x51   :  { %2441 = vmatprep.subr.mxu0 %v2829_v0 }
  0x52   :  { %2442 = vmatpush3.msra.mxu0 %v2916_v24 }
  0x53   :  { %198 = vmatmul.mubr.f32.gmra.mxu0 %v70_v39  ;;  %2523 = vmatprep.subr.mxu0 %v2829_v0 }
  0x54   :  { %203 = vmatprep.mubr.f32.mxu0 %v2829_v0 }
  0x57   :  { %204 = vmatmul.mubr.f32.gmra.mxu0 %v71_v40 }
  0x58   :  { %209 = vmatprep.mubr.f32.mxu0 %v2829_v0 }
  0x5b   :  { %210 = vmatmul.mubr.f32.gmra.mxu0 %v72_v41 }
  0x5c   :  { %215 = vmatprep.mubr.f32.mxu0 %v2829_v0 }
  0x5f   :  { %216 = vmatmul.mubr.f32.gmra.mxu0 %v73_v42 }
  0x60   :  { %221 = vmatprep.mubr.f32.mxu0 %v2829_v0 }
  0x63   :  { %222 = vmatmul.mubr.f32.gmra.mxu0 %v74_v43 }
  0x64   :  { %227 = vmatprep.mubr.f32.mxu0 %v2829_v0 }
  0x67   :  { %228 = vmatmul.mubr.f32.gmra.mxu0 %v75_v44 }
  0x68   :  { %233 = vmatprep.mubr.f32.mxu0 %v2829_v0 }
  0x6b   :  { %234 = vmatmul.mubr.f32.gmra.mxu0 %v76_v45 }
  0x6c   :  { %2443 = vmatprep.mubr.msk.f32.mxu0 %vm2830_vm0, %v2829_v0 }
  0x6f   :  { %2444 = vmatmul.mubr.f32.vlgmr.msra.gmra.mxu0 %v2829_v0 }
  0x70   :  { %2531 = vmatprep.mubr.msk.f32.mxu0 %vm2830_vm0, %v2829_v0 }
 0x10b   :  { %v187_v51 = vpop.f32.mrf.mxu0 }
 0x10d   :  { %v189_v52 = vpop.f32.mrf.mxu0 }
 0x10e   :  { %v2946_v53 = vadd.f32 %v189_v52, %v118_v50 }
 0x10f   :  { %v193_v55 = vpop.f32.mrf.mxu0 }
 0x110   :  { %v194_v31 = vadd.f32 %v193_v55, %v114_v57 }
 0x111   :  { %v195_v56 = vpop.f32.mrf.mxu0 }
 0x112   :  { %v2948_v58 = vadd.f32 %v195_v56, %v118_v50 }
 0x113   :  { %v199_v59 = vpop.f32.mrf.mxu0 }
 0x114   :  { %v2950_v60 = vadd.f32 %v199_v59, %v114_v57 }
 0x115   :  { %v201_v61 = vpop.f32.mrf.mxu0 }
 0x116   :  { %v2952_v62 = vadd.f32 %v201_v61, %v118_v50 }
 0x117   :  { %v205_v63 = vpop.f32.mrf.mxu0 }
 0x118   :  { %v2954_v1 = vadd.f32 %v205_v63, %v114_v57 }
 0x119   :  { %v207_v2 = vpop.f32.mrf.mxu0 }
 0x11a   :  { %v2956_v3 = vadd.f32 %v207_v2, %v118_v50 }
 0x11b   :  { %v211_v4 = vpop.f32.mrf.mxu0 }
 0x11c   :  { %v2958_v5 = vadd.f32 %v211_v4, %v114_v57 }
 0x11d   :  { %v213_v6 = vpop.f32.mrf.mxu0 }
 0x11e   :  { %v2960_v7 = vadd.f32 %v213_v6, %v118_v50 }
 0x11f   :  { %v217_v8 = vpop.f32.mrf.mxu0 }
 0x120   :  { %v2962_v9 = vadd.f32 %v217_v8, %v114_v57 }
 0x121   :  { %v219_v10 = vpop.f32.mrf.mxu0 }
 0x122   :  { %v2964_v11 = vadd.f32 %v219_v10, %v118_v50 }
 0x123   :  { %v223_v12 = vpop.f32.mrf.mxu0 }
 0x124   :  { %v2966_v13 = vadd.f32 %v223_v12, %v114_v57 }
 0x125   :  { %v225_v14 = vpop.f32.mrf.mxu0 }
 0x126   :  { %v2968_v16 = vadd.f32 %v225_v14, %v118_v50 }
 0x127   :  { %v229_v17 = vpop.f32.mrf.mxu0 }
 0x128   :  { %v2970_v19 = vadd.f32 %v229_v17, %v114_v57 }
 0x129   :  { %v231_v20 = vpop.f32.mrf.mxu0 }
 0x12a   :  { %v2972_v22 = vadd.f32 %v231_v20, %v118_v50 }
 0x12b   :  { %v235_v23 = vpop.f32.mrf.mxu0 }
 0x12c   :  { %v2974_v25 = vadd.f32 %v235_v23, %v114_v57 }
 0x12d   :  { %v237_v26 = vpop.f32.mrf.mxu0 }
 0x12f   :  { %v340_v28 = vpop.f32.mrf.mxu0 }
 0x130   :  { %v341_v29 = vadd.f32 %v2979_v27, %v340_v28 }
 0x131   :  { %v2445_v30 = vpop.f32.mrf.mxu0 }
 0x132   :  { %352 = vrot.lane.b32.xlu0 %v341_v29, %s2831_s30  ;;  %v344_v32 = vadd.f32 %v341_v29, %v194_v31 }
 0x134   :  { %v2313_v33 = vmul.f32 -1.442695, %v344_v32 }
 0x136   :  { %2628 = vpow2.f32 %v2313_v33 }
 0x143   :  { %v2629_v34 = vpop.eup %2628 }
 0x144   :  { %v348_v35 = vadd.f32 1.0, %v2629_v34 }
 0x146   :  { %2630 = vrcp.f32 %v348_v35 }
 0x153   :  { %v2631_v36 = vpop.eup %2630 }
 0x154   :  { %v362_v42 = vsub.f32 1.0, %v2631_v36  ;;  %v368_v44 = vmul.f32 0.0, %v2631_v36 }
 0x1a4   :  { %v353_v37 = vpop.permute.xlu0 %352 }
 0x1a5   :  { %v355_v38 = vmul.f32 %v2631_v36, %v353_v37 }
 0x1a7   :  { %357 = vrot.lane.b32.xlu0 %v355_v38, %s2831_s30 }
 0x219   :  { %v358_v39 = vpop.permute.xlu0 %357 }
 0x21a   :  { %v360_v40 = vadd.f32 %v358_v39, %v194_v31 }
 0x21c   :  { %2632 = vtanh.f32 %v360_v40 }
 0x229   :  { %v2633_v41 = vpop.eup %2632 }
 0x22a   :  { %364 = vrot.lane.b32.xlu1 %v2633_v41, %s2832_s8 }
 0x29c   :  { %v365_v43 = vpop.permute.xlu1 %364 }
 0x29d   :  { %v367_v45 = vmul.f32 %v365_v43, %v362_v42 }
 0x29f   :  { %v369_v46 = vadd.f32 %v368_v44, %v367_v45 }
 0x2a1   :  { %372 = vrot.lane.b32.xlu1 %v369_v46, %s2832_s8 }
 0x313   :  { %v373_v47 = vpop.permute.xlu1 %372 }
 0x314   :  { %2455 = vmatmul.mubr.msk.f32.vlgmr.msra.gmra.mxu1 %vm270_vm1, %v373_v47 }
 0x315   :  { %2458 = vmatpush3.msra.mxu1 %v2896_v15  ;;  %2465 = vmatprep.mubr.msk.f32.mxu1 %vm2830_vm0, %v2829_v0 }
 0x316   :  { %2459 = vmatprep.subr.mxu1 %v2829_v0 }
 0x317   :  { %2460 = vmatpush3.msra.mxu1 %v2902_v18 }
 0x318   :  { %2461 = vmatprep.subr.mxu1 %v2829_v0 }
 0x319   :  { %2462 = vmatpush3.msra.mxu1 %v2909_v21 }
 0x31a   :  { %2463 = vmatprep.subr.mxu1 %v2829_v0 }
 0x31b   :  { %2464 = vmatpush3.msra.mxu1 %v2916_v24 }
 0x31c   :  { %2468 = vmatprep.subr.mxu1 %v2829_v0 }
 0x3d4   :  { %v442_v48 = vpop.f32.mrf.mxu1 }
 0x3d5   :  { %v443_v49 = vadd.f32 %v2979_v27, %v442_v48 }
 0x3d6   :  { %v2456_v50 = vpop.f32.mrf.mxu1 }
 0x3d7   :  { %454 = vrot.lane.b32.xlu0 %v443_v49, %s2831_s30  ;;  %v446_v51 = vadd.f32 %v443_v49, %v2950_v60 }
 0x3d9   :  { %v2315_v52 = vmul.f32 -1.442695, %v446_v51 }
 0x3db   :  { %2634 = vpow2.f32 %v2315_v52 }
 0x3e8   :  { %v2635_v54 = vpop.eup %2634 }
 0x3e9   :  { %v450_v55 = vadd.f32 1.0, %v2635_v54 }
 0x3eb   :  { %2636 = vrcp.f32 %v450_v55 }
 0x3f8   :  { %v2637_v56 = vpop.eup %2636 }
 0x3f9   :  { %v464_v4 = vsub.f32 1.0, %v2637_v56  ;;  %v470_v8 = vmul.f32 %v2637_v56, %v369_v46 }
 0x449   :  { %v455_v57 = vpop.permute.xlu0 %454 }
 0x44a   :  { %v457_v59 = vmul.f32 %v2637_v56, %v455_v57 }
 0x44c   :  { %459 = vrot.lane.b32.xlu1 %v457_v59, %s2831_s30 }
 0x4be   :  { %v460_v61 = vpop.permute.xlu1 %459 }
 0x4bf   :  { %v462_v63 = vadd.f32 %v460_v61, %v2950_v60 }
 0x4c1   :  { %2638 = vtanh.f32 %v462_v63 }
 0x4ce   :  { %v2639_v2 = vpop.eup %2638 }
 0x4cf   :  { %466 = vrot.lane.b32.xlu0 %v2639_v2, %s2832_s8 }
 0x541   :  { %v467_v6 = vpop.permute.xlu0 %466 }
 0x542   :  { %v469_v10 = vmul.f32 %v467_v6, %v464_v4 }
 0x544   :  { %v471_v12 = vadd.f32 %v470_v8, %v469_v10 }
 0x546   :  { %474 = vrot.lane.b32.xlu1 %v471_v12, %s2832_s8 }
 0x5b8   :  { %v475_v14 = vpop.permute.xlu1 %474 }
 0x5b9   :  { %2466 = vmatmul.mubr.msk.f32.vlgmr.msra.gmra.mxu1 %vm270_vm1, %v475_v14 }
 0x5ba   :  { %2469 = vmatpush3.msra.mxu1 %v2896_v15  ;;  %2476 = vmatprep.mubr.msk.f32.mxu1 %vm2830_vm0, %v2829_v0 }
 0x5bb   :  { %2470 = vmatprep.subr.mxu1 %v2829_v0 }
 0x5bc   :  { %2471 = vmatpush3.msra.mxu1 %v2902_v18 }
 0x5bd   :  { %2472 = vmatprep.subr.mxu1 %v2829_v0 }
 0x5be   :  { %2473 = vmatpush3.msra.mxu1 %v2909_v21 }
 0x5bf   :  { %2474 = vmatprep.subr.mxu1 %v2829_v0 }
 0x5c0   :  { %2475 = vmatpush3.msra.mxu1 %v2916_v24 }
 0x5c1   :  { %2479 = vmatprep.subr.mxu1 %v2829_v0 }
 0x679   :  { %v544_v60 = vpop.f32.mrf.mxu1 }
 0x67a   :  { %v545_v17 = vadd.f32 %v2979_v27, %v544_v60 }
 0x67b   :  { %v2467_v20 = vpop.f32.mrf.mxu1 }
 0x67c   :  { %556 = vrot.lane.b32.xlu0 %v545_v17, %s2831_s30  ;;  %v548_v23 = vadd.f32 %v545_v17, %v2954_v1 }
 0x67e   :  { %v2317_v26 = vmul.f32 -1.442695, %v548_v23 }
 0x680   :  { %2640 = vpow2.f32 %v2317_v26 }
 0x68d   :  { %v2641_v28 = vpop.eup %2640 }
 0x68e   :  { %v552_v29 = vadd.f32 1.0, %v2641_v28 }
 0x690   :  { %2642 = vrcp.f32 %v552_v29 }
 0x69d   :  { %v2643_v30 = vpop.eup %2642 }
 0x69e   :  { %v566_v36 = vsub.f32 1.0, %v2643_v30  ;;  %v572_v38 = vmul.f32 %v2643_v30, %v471_v12 }
 0x6ee   :  { %v557_v31 = vpop.permute.xlu0 %556 }
 0x6ef   :  { %v559_v32 = vmul.f32 %v2643_v30, %v557_v31 }
 0x6f1   :  { %561 = vrot.lane.b32.xlu1 %v559_v32, %s2831_s30 }
 0x763   :  { %v562_v33 = vpop.permute.xlu1 %561 }
 0x764   :  { %v564_v34 = vadd.f32 %v562_v33, %v2954_v1 }
 0x766   :  { %2644 = vtanh.f32 %v564_v34 }
 0x773   :  { %v2645_v35 = vpop.eup %2644 }
 0x774   :  { %568 = vrot.lane.b32.xlu0 %v2645_v35, %s2832_s8 }
 0x7e6   :  { %v569_v37 = vpop.permute.xlu0 %568 }
 0x7e7   :  { %v571_v39 = vmul.f32 %v569_v37, %v566_v36 }
 0x7e9   :  { %v573_v40 = vadd.f32 %v572_v38, %v571_v39 }
 0x7eb   :  { %576 = vrot.lane.b32.xlu1 %v573_v40, %s2832_s8 }
 0x85d   :  { %v577_v41 = vpop.permute.xlu1 %576 }
 0x85e   :  { %2477 = vmatmul.mubr.msk.f32.vlgmr.msra.gmra.mxu1 %vm270_vm1, %v577_v41 }
 0x85f   :  { %2480 = vmatpush3.msra.mxu1 %v2896_v15  ;;  %2487 = vmatprep.mubr.msk.f32.mxu1 %vm2830_vm0, %v2829_v0 }
 0x860   :  { %2481 = vmatprep.subr.mxu1 %v2829_v0 }
 0x861   :  { %2482 = vmatpush3.msra.mxu1 %v2902_v18 }
 0x862   :  { %2483 = vmatprep.subr.mxu1 %v2829_v0 }
 0x863   :  { %2484 = vmatpush3.msra.mxu1 %v2909_v21 }
 0x864   :  { %2485 = vmatprep.subr.mxu1 %v2829_v0 }
 0x865   :  { %2486 = vmatpush3.msra.mxu1 %v2916_v24 }
 0x866   :  { %2490 = vmatprep.subr.mxu1 %v2829_v0 }
 0x91e   :  { %v646_v1 = vpop.f32.mrf.mxu1 }
 0x91f   :  { %v647_v42 = vadd.f32 %v2979_v27, %v646_v1 }
 0x920   :  { %v2478_v43 = vpop.f32.mrf.mxu1 }
 0x921   :  { %658 = vrot.lane.b32.xlu0 %v647_v42, %s2831_s30  ;;  %v650_v44 = vadd.f32 %v647_v42, %v2958_v5 }
 0x923   :  { %v2319_v45 = vmul.f32 -1.442695, %v650_v44 }
 0x925   :  { %2646 = vpow2.f32 %v2319_v45 }
 0x932   :  { %v2647_v46 = vpop.eup %2646 }
 0x933   :  { %v654_v47 = vadd.f32 1.0, %v2647_v46 }
 0x935   :  { %2648 = vrcp.f32 %v654_v47 }
 0x942   :  { %v2649_v48 = vpop.eup %2648 }
 0x943   :  { %v668_v55 = vsub.f32 1.0, %v2649_v48  ;;  %v674_v57 = vmul.f32 %v2649_v48, %v573_v40 }
 0x993   :  { %v659_v49 = vpop.permute.xlu0 %658 }
 0x994   :  { %v661_v50 = vmul.f32 %v2649_v48, %v659_v49 }
 0x996   :  { %663 = vrot.lane.b32.xlu1 %v661_v50, %s2831_s30 }
 0xa08   :  { %v664_v51 = vpop.permute.xlu1 %663 }
 0xa09   :  { %v666_v52 = vadd.f32 %v664_v51, %v2958_v5 }
 0xa0b   :  { %2650 = vtanh.f32 %v666_v52 }
 0xa18   :  { %v2651_v54 = vpop.eup %2650 }
 0xa19   :  { %670 = vrot.lane.b32.xlu0 %v2651_v54, %s2832_s8 }
 0xa8b   :  { %v671_v56 = vpop.permute.xlu0 %670 }
 0xa8c   :  { %v673_v59 = vmul.f32 %v671_v56, %v668_v55 }
 0xa8e   :  { %v675_v61 = vadd.f32 %v674_v57, %v673_v59 }
 0xa90   :  { %678 = vrot.lane.b32.xlu1 %v675_v61, %s2832_s8 }
 0xb02   :  { %v679_v63 = vpop.permute.xlu1 %678 }
 0xb03   :  { %2488 = vmatmul.mubr.msk.f32.vlgmr.msra.gmra.mxu1 %vm270_vm1, %v679_v63 }
 0xb04   :  { %2491 = vmatpush3.msra.mxu1 %v2896_v15  ;;  %2498 = vmatprep.mubr.msk.f32.mxu1 %vm2830_vm0, %v2829_v0 }
 0xb05   :  { %2492 = vmatprep.subr.mxu1 %v2829_v0 }
 0xb06   :  { %2493 = vmatpush3.msra.mxu1 %v2902_v18 }
 0xb07   :  { %2494 = vmatprep.subr.mxu1 %v2829_v0 }
 0xb08   :  { %2495 = vmatpush3.msra.mxu1 %v2909_v21 }
 0xb09   :  { %2496 = vmatprep.subr.mxu1 %v2829_v0 }
 0xb0a   :  { %2497 = vmatpush3.msra.mxu1 %v2916_v24 }
 0xb0b   :  { %2501 = vmatprep.subr.mxu1 %v2829_v0 }
 0xbc3   :  { %v748_v5 = vpop.f32.mrf.mxu1 }
 0xbc4   :  { %v749_v2 = vadd.f32 %v2979_v27, %v748_v5 }
 0xbc5   :  { %v2489_v4 = vpop.f32.mrf.mxu1 }
 0xbc6   :  { %760 = vrot.lane.b32.xlu0 %v749_v2, %s2831_s30  ;;  %v752_v6 = vadd.f32 %v749_v2, %v2962_v9 }
 0xbc8   :  { %v2321_v8 = vmul.f32 -1.442695, %v752_v6 }
 0xbca   :  { %2652 = vpow2.f32 %v2321_v8 }
 0xbd7   :  { %v2653_v10 = vpop.eup %2652 }
 0xbd8   :  { %v756_v12 = vadd.f32 1.0, %v2653_v10 }
 0xbda   :  { %2654 = vrcp.f32 %v756_v12 }
 0xbe7   :  { %v2655_v14 = vpop.eup %2654 }
 0xbe8   :  { %v770_v28 = vsub.f32 1.0, %v2655_v14  ;;  %v776_v30 = vmul.f32 %v2655_v14, %v675_v61 }
 0xc38   :  { %v761_v60 = vpop.permute.xlu0 %760 }
 0xc39   :  { %v763_v17 = vmul.f32 %v2655_v14, %v761_v60 }
 0xc3b   :  { %765 = vrot.lane.b32.xlu1 %v763_v17, %s2831_s30 }
 0xcad   :  { %v766_v20 = vpop.permute.xlu1 %765 }
 0xcae   :  { %v768_v23 = vadd.f32 %v766_v20, %v2962_v9 }
 0xcb0   :  { %2656 = vtanh.f32 %v768_v23 }
 0xcbd   :  { %v2657_v26 = vpop.eup %2656 }
 0xcbe   :  { %772 = vrot.lane.b32.xlu0 %v2657_v26, %s2832_s8 }
 0xd30   :  { %v773_v29 = vpop.permute.xlu0 %772 }
 0xd31   :  { %v775_v31 = vmul.f32 %v773_v29, %v770_v28 }
 0xd33   :  { %v777_v32 = vadd.f32 %v776_v30, %v775_v31  ;;  %v1086_v31 = vld [vmem:[%s3318_s3 + $0x28] sm:$0xff] }
 0xd35   :  { %780 = vrot.lane.b32.xlu1 %v777_v32, %s2832_s8 }
 0xda7   :  { %v781_v33 = vpop.permute.xlu1 %780 }
 0xda8   :  { %2499 = vmatmul.mubr.msk.f32.vlgmr.msra.gmra.mxu1 %vm270_vm1, %v781_v33 }
 0xda9   :  { %2502 = vmatpush3.msra.mxu1 %v2896_v15  ;;  %2509 = vmatprep.mubr.msk.f32.mxu1 %vm2830_vm0, %v2829_v0 }
 0xdaa   :  { %2503 = vmatprep.subr.mxu1 %v2829_v0 }
 0xdab   :  { %2504 = vmatpush3.msra.mxu1 %v2902_v18 }
 0xdac   :  { %2505 = vmatprep.subr.mxu1 %v2829_v0 }
 0xdad   :  { %2506 = vmatpush3.msra.mxu1 %v2909_v21 }
 0xdae   :  { %2507 = vmatprep.subr.mxu1 %v2829_v0 }
 0xdaf   :  { %2508 = vmatpush3.msra.mxu1 %v2916_v24 }
 0xdb0   :  { %2512 = vmatprep.subr.mxu1 %v2829_v0 }
 0xe68   :  { %v850_v9 = vpop.f32.mrf.mxu1 }
 0xe69   :  { %v851_v34 = vadd.f32 %v2979_v27, %v850_v9 }
 0xe6a   :  { %v2500_v35 = vpop.f32.mrf.mxu1 }
 0xe6b   :  { %862 = vrot.lane.b32.xlu0 %v851_v34, %s2831_s30  ;;  %v854_v36 = vadd.f32 %v851_v34, %v2966_v13 }
 0xe6d   :  { %v2323_v37 = vmul.f32 -1.442695, %v854_v36 }
 0xe6f   :  { %2658 = vpow2.f32 %v2323_v37 }
 0xe7c   :  { %v2659_v38 = vpop.eup %2658 }
 0xe7d   :  { %v858_v39 = vadd.f32 1.0, %v2659_v38 }
 0xe7f   :  { %2660 = vrcp.f32 %v858_v39  ;;  %v3124_v39 = vld [vmem:[#allocation10 + $0x10] sm:$0xff] }
 0xe8c   :  { %v2661_v40 = vpop.eup %2660 }
 0xe8d   :  { %v872_v45 = vsub.f32 1.0, %v2661_v40  ;;  %v878_v47 = vmul.f32 %v2661_v40, %v777_v32  ;;  %v1085_v32 = vld [vmem:[%s3318_s3 + $0x18] sm:$0xff] }
 0xedd   :  { %v863_v41 = vpop.permute.xlu0 %862 }
 0xede   :  { %v865_v1 = vmul.f32 %v2661_v40, %v863_v41  ;;  %v3129_v40 = vld [vmem:[#allocation10] sm:$0xff]  ;;  %v2328_v41 = vld [vmem:[%s3320_s5 + $0x4] ss:$0 sm:$0xff] }
 0xee0   :  { %867 = vrot.lane.b32.xlu1 %v865_v1, %s2831_s30 }
 0xf52   :  { %v868_v42 = vpop.permute.xlu1 %867 }
 0xf53   :  { %v870_v43 = vadd.f32 %v868_v42, %v2966_v13 }
 0xf55   :  { %2662 = vtanh.f32 %v870_v43 }
 0xf62   :  { %v2663_v44 = vpop.eup %2662 }
 0xf63   :  { %874 = vrot.lane.b32.xlu0 %v2663_v44, %s2832_s8  ;;  %v3152_v44 = vld [vmem:[%s3320_s5 + $0x3] ss:$0 sm:$0xff] }
 0xfd5   :  { %v875_v46 = vpop.permute.xlu0 %874 }
 0xfd6   :  { %v877_v48 = vmul.f32 %v875_v46, %v872_v45 }
 0xfd8   :  { %v879_v49 = vadd.f32 %v878_v47, %v877_v48 }
 0xfda   :  { %882 = vrot.lane.b32.xlu1 %v879_v49, %s2832_s8 }
0x104c   :  { %v883_v50 = vpop.permute.xlu1 %882 }
0x104d   :  { %2510 = vmatmul.mubr.msk.f32.vlgmr.msra.gmra.mxu1 %vm270_vm1, %v883_v50 }
0x104e   :  { %2513 = vmatpush3.msra.mxu1 %v2896_v15  ;;  %2520 = vmatprep.mubr.msk.f32.mxu1 %vm2830_vm0, %v2829_v0 }
0x104f   :  { %2514 = vmatprep.subr.mxu1 %v2829_v0 }
0x1050   :  { %2515 = vmatpush3.msra.mxu1 %v2902_v18 }
0x1051   :  { %2516 = vmatprep.subr.mxu1 %v2829_v0 }
0x1052   :  { %2517 = vmatpush3.msra.mxu1 %v2909_v21 }
0x1053   :  { %2518 = vmatprep.subr.mxu1 %v2829_v0 }
0x1054   :  { %2519 = vmatpush3.msra.mxu1 %v2916_v24 }
0x1055   :  { %2534 = vmatprep.subr.mxu1 %v2829_v0 }
0x110d   :  { %v952_v13 = vpop.f32.mrf.mxu1 }
0x110e   :  { %v953_v15 = vadd.f32 %v2979_v27, %v952_v13 }
0x110f   :  { %v2511_v51 = vpop.f32.mrf.mxu1 }
0x1110   :  { %964 = vrot.lane.b32.xlu0 %v953_v15, %s2831_s30  ;;  %v956_v52 = vadd.f32 %v953_v15, %v2970_v19 }
0x1112   :  { %v2325_v54 = vmul.f32 -1.442695, %v956_v52 }
0x1114   :  { %2664 = vpow2.f32 %v2325_v54 }
0x1121   :  { %v2665_v18 = vpop.eup %2664 }
0x1122   :  { %v960_v55 = vadd.f32 1.0, %v2665_v18 }
0x1124   :  { %2666 = vrcp.f32 %v960_v55 }
0x1131   :  { %v2667_v21 = vpop.eup %2666 }
0x1132   :  { %v974_v63 = vsub.f32 1.0, %v2667_v21  ;;  %v980_v2 = vmul.f32 %v2667_v21, %v879_v49 }
0x1182   :  { %v965_v56 = vpop.permute.xlu0 %964 }
0x1183   :  { %v967_v57 = vmul.f32 %v2667_v21, %v965_v56 }
0x1185   :  { %969 = vrot.lane.b32.xlu1 %v967_v57, %s2831_s30 }
0x11f7   :  { %v970_v24 = vpop.permute.xlu1 %969 }
0x11f8   :  { %v972_v59 = vadd.f32 %v970_v24, %v2970_v19 }
0x11fa   :  { %2668 = vtanh.f32 %v972_v59 }
0x1207   :  { %v2669_v61 = vpop.eup %2668 }
0x1208   :  { %976 = vrot.lane.b32.xlu0 %v2669_v61, %s2832_s8 }
0x127a   :  { %v977_v5 = vpop.permute.xlu0 %976 }
0x127b   :  { %v979_v4 = vmul.f32 %v977_v5, %v974_v63 }
0x127d   :  { %v981_v6 = vadd.f32 %v980_v2, %v979_v4 }
0x127f   :  { %984 = vrot.lane.b32.xlu1 %v981_v6, %s2832_s8 }
0x12f1   :  { %v985_v8 = vpop.permute.xlu1 %984 }
0x12f2   :  { %2521 = vmatmul.mubr.msk.f32.vlgmr.msra.gmra.mxu1 %vm270_vm1, %v985_v8 }
0x12f3   :  { %2538 = vmatprep.mubr.msk.f32.mxu1 %vm2830_vm0, %v2829_v0  ;;  %2535 = vmatpush3.msra.mxu1 %v3124_v39 }
0x12f4   :  { %2536 = vmatprep.subr.mxu1 %v2829_v0 }
0x12f5   :  { %2537 = vmatpush3.msra.mxu1 %v3129_v40 }
0x12f6   :  { %2548 = vmatprep.subr.mxu1 %v2829_v0 }
0x13b2   :  { %v1054_v10 = vpop.f32.mrf.mxu1 }
0x13b3   :  { %v1055_v19 = vadd.f32 %v2979_v27, %v1054_v10  ;;  %v1087_v27 = vld [vmem:[%s3318_s3 + $0x38] sm:$0xff] }
0x13b4   :  { %v2522_v12 = vpop.f32.mrf.mxu1  ;;  %2524 = vmatpush3.msra.mxu0 %v1087_v27 }
0x13b5   :  { %1066 = vrot.lane.b32.xlu0 %v1055_v19, %s2831_s30  ;;  %v1058_v14 = vadd.f32 %v1055_v19, %v2974_v25  ;;  %2525 = vmatprep.subr.mxu0 %v2829_v0 }
0x13b6   :  { %2526 = vmatpush3.msra.mxu0 %v1086_v31 }
0x13b7   :  { %v2327_v60 = vmul.f32 -1.442695, %v1058_v14  ;;  %2527 = vmatprep.subr.mxu0 %v2829_v0 }
0x13b8   :  { %2528 = vmatpush3.msra.mxu0 %v1085_v32 }
0x13b9   :  { %2670 = vpow2.f32 %v2327_v60  ;;  %2529 = vmatprep.subr.mxu0 %v2829_v0 }
0x13c6   :  { %v2671_v17 = vpop.eup %2670 }
0x13c7   :  { %v1062_v20 = vadd.f32 1.0, %v2671_v17 }
0x13c9   :  { %2672 = vrcp.f32 %v1062_v20 }
0x13d6   :  { %v2673_v23 = vpop.eup %2672 }
0x13d7   :  { %v1076_v9 = vsub.f32 1.0, %v2673_v23  ;;  %v1082_v35 = vmul.f32 %v2673_v23, %v981_v6 }
0x1427   :  { %v1067_v26 = vpop.permute.xlu0 %1066 }
0x1428   :  { %v1069_v28 = vmul.f32 %v2673_v23, %v1067_v26 }
0x142a   :  { %1071 = vrot.lane.b32.xlu1 %v1069_v28, %s2831_s30 }
0x149c   :  { %v1072_v29 = vpop.permute.xlu1 %1071 }
0x149d   :  { %v1074_v30 = vadd.f32 %v1072_v29, %v2974_v25  ;;  %v1084_v25 = vld [vmem:[%s3318_s3 + $0x8] sm:$0xff] }
0x149e   :  { %2530 = vmatpush3.msra.mxu0 %v1084_v25 }
0x149f   :  { %2674 = vtanh.f32 %v1074_v30  ;;  %2541 = vmatprep.subr.mxu0 %v2829_v0 }
0x14ac   :  { %v2675_v33 = vpop.eup %2674 }
0x14ad   :  { %1078 = vrot.lane.b32.xlu0 %v2675_v33, %s2832_s8 }
0x151f   :  { %v1079_v34 = vpop.permute.xlu0 %1078 }
0x1520   :  { %v1081_v36 = vmul.f32 %v1079_v34, %v1076_v9 }
0x1522   :  { %v1083_v37 = vadd.f32 %v1082_v35, %v1081_v36 }
0x1524   :  { %1096 = vrot.lane.b32.xlu1 %v1083_v37, %s2832_s8 }
0x1596   :  { %v1097_v38 = vpop.permute.xlu1 %1096 }
0x1597   :  { %2282 = vst.msk [vmem:[#allocation12] sm:$0xff] %vm270_vm1, %v1097_v38  ;;  %2532 = vmatmul.mubr.msk.f32.vlgmr.msra.gmra.mxu0 %vm270_vm1, %v1097_v38 }
0x1598   :  { %2545 = vmatprep.mubr.msk.f32.mxu0 %vm2830_vm0, %v2829_v0  ;;  %2542 = vmatpush3.msra.mxu0 %v3124_v39 }
0x1599   :  { %2543 = vmatprep.subr.mxu0 %v2829_v0 }
0x159a   :  { %2544 = vmatpush3.msra.mxu0 %v3129_v40 }
0x159b   :  { %2555 = vmatprep.subr.mxu0 %v2829_v0 }
0x1657   :  { %v1166_v1 = vpop.f32.mrf.mxu0 }
0x1658   :  { %v3139_v42 = vadd.f32 %v2328_v41, %v1166_v1 }
0x1659   :  { %v2533_v43 = vpop.f32.mrf.mxu0 }
0x165a   :  { %2539 = vmatmul.mubr.msk.f32.vlgmr.msra.gmra.mxu1 %vm1180_vm2, %v3139_v42 }
0x165b   :  { %2549 = vmatpush3.msra.mxu1 %v3124_v39  ;;  %2552 = vmatprep.mubr.msk.f32.mxu1 %vm2830_vm0, %v2829_v0 }
0x165c   :  { %2550 = vmatprep.subr.mxu1 %v2829_v0 }
0x165d   :  { %2551 = vmatpush3.msra.mxu1 %v3129_v40 }
0x165e   :  { %2562 = vmatprep.subr.mxu1 %v2829_v0 }
0x171a   :  { %v1250_v45 = vpop.f32.mrf.mxu1 }
0x171b   :  { %v1251_v46 = vadd.f32 %v3152_v44, %v1250_v45 }
0x171c   :  { %v2540_v47 = vpop.f32.mrf.mxu1 }
0x171d   :  { %1262 = vrot.lane.b32.xlu0 %v1251_v46, %s2832_s8  ;;  %v1254_v48 = vadd.f32 %v1251_v46, %v2946_v53 }
0x171f   :  { %v2332_v49 = vmul.f32 -1.442695, %v1254_v48 }
0x1721   :  { %2676 = vpow2.f32 %v2332_v49 }
0x172e   :  { %v2677_v50 = vpop.eup %2676 }
0x172f   :  { %v1258_v13 = vadd.f32 1.0, %v2677_v50 }
0x1731   :  { %2678 = vrcp.f32 %v1258_v13 }
0x173e   :  { %v2679_v15 = vpop.eup %2678 }
0x173f   :  { %v1272_v56 = vsub.f32 1.0, %v2679_v15 }
0x178f   :  { %v1263_v51 = vpop.permute.xlu0 %1262 }
0x1790   :  { %v1265_v52 = vmul.f32 %v2679_v15, %v1263_v51 }
0x1792   :  { %1267 = vrot.lane.b32.xlu1 %v1265_v52, %s2833_s0 }
0x1796   :  { %1278 = vrot.lane.b32.xlu1 %v3139_v42, %s2824_s28 }
0x1804   :  { %v1268_v54 = vpop.permute.xlu1 %1267 }
0x1805   :  { %v1270_v18 = vadd.f32 %v1268_v54, %v2946_v53 }
0x1807   :  { %2680 = vtanh.f32 %v1270_v18 }
0x1808   :  { %v1279_v21 = vpop.permute.xlu1 %1278 }
0x1809   :  { %v1281_v24 = vmul.f32 %v2679_v15, %v1279_v21 }
0x1814   :  { %v2681_v55 = vpop.eup %2680 }
0x1815   :  { %1274 = vrot.lane.b32.xlu0 %v2681_v55, %s2834_s4 }
0x1887   :  { %v1275_v57 = vpop.permute.xlu0 %1274 }
0x1888   :  { %v1277_v59 = vmul.f32 %v1275_v57, %v1272_v56 }
0x188a   :  { %v1282_v61 = vadd.f32 %v1281_v24, %v1277_v59 }
0x188c   :  { %1284 = vrot.lane.b32.xlu0 %v1282_v61, %s2834_s4 }
0x18fe   :  { %v1285_v63 = vpop.permute.xlu0 %1284 }
0x18ff   :  { %1287 = vst.msk [vmem:[#allocation3] sm:$0xff] %vm1180_vm2, %v1285_v63  ;;  %2546 = vmatmul.mubr.msk.f32.vlgmr.msra.gmra.mxu0 %vm1180_vm2, %v1285_v63 }
0x1900   :  { %2556 = vmatpush3.msra.mxu0 %v3124_v39  ;;  %2559 = vmatprep.mubr.msk.f32.mxu0 %vm2830_vm0, %v2829_v0 }
0x1901   :  { %2557 = vmatprep.subr.mxu0 %v2829_v0 }
0x1902   :  { %2558 = vmatpush3.msra.mxu0 %v3129_v40 }
0x1903   :  { %2569 = vmatprep.subr.mxu0 %v2829_v0 }
0x19bf   :  { %v1357_v53 = vpop.f32.mrf.mxu0 }
0x19c0   :  { %v1358_v5 = vadd.f32 %v3152_v44, %v1357_v53 }
0x19c1   :  { %v2547_v2 = vpop.f32.mrf.mxu0 }
0x19c2   :  { %1369 = vrot.lane.b32.xlu1 %v1358_v5, %s2832_s8  ;;  %v1361_v4 = vadd.f32 %v1358_v5, %v2948_v58 }
0x19c4   :  { %v2334_v6 = vmul.f32 -1.442695, %v1361_v4 }
0x19c6   :  { %2682 = vpow2.f32 %v2334_v6 }
0x19d3   :  { %v2683_v8 = vpop.eup %2682 }
0x19d4   :  { %v1365_v10 = vadd.f32 1.0, %v2683_v8 }
0x19d6   :  { %2684 = vrcp.f32 %v1365_v10 }
0x19e3   :  { %v2685_v19 = vpop.eup %2684 }
0x19e4   :  { %v1379_v23 = vsub.f32 1.0, %v2685_v19  ;;  %v1385_v28 = vmul.f32 %v2685_v19, %v1282_v61 }
0x1a34   :  { %v1370_v12 = vpop.permute.xlu1 %1369 }
0x1a35   :  { %v1372_v14 = vmul.f32 %v2685_v19, %v1370_v12 }
0x1a37   :  { %1374 = vrot.lane.b32.xlu0 %v1372_v14, %s2833_s0 }
0x1aa9   :  { %v1375_v60 = vpop.permute.xlu0 %1374 }
0x1aaa   :  { %v1377_v17 = vadd.f32 %v1375_v60, %v2948_v58 }
0x1aac   :  { %2686 = vtanh.f32 %v1377_v17 }
0x1ab9   :  { %v2687_v20 = vpop.eup %2686 }
0x1aba   :  { %1381 = vrot.lane.b32.xlu1 %v2687_v20, %s2834_s4 }
0x1b2c   :  { %v1382_v26 = vpop.permute.xlu1 %1381 }
0x1b2d   :  { %v1384_v29 = vmul.f32 %v1382_v26, %v1379_v23 }
0x1b2f   :  { %v1386_v30 = vadd.f32 %v1385_v28, %v1384_v29 }
0x1b31   :  { %1388 = vrot.lane.b32.xlu0 %v1386_v30, %s2834_s4 }
0x1ba3   :  { %v1389_v27 = vpop.permute.xlu0 %1388 }
0x1ba4   :  { %1391 = vst.msk [vmem:[#allocation3 + $0x8] sm:$0xff] %vm1180_vm2, %v1389_v27  ;;  %2553 = vmatmul.mubr.msk.f32.vlgmr.msra.gmra.mxu1 %vm1180_vm2, %v1389_v27 }
0x1ba5   :  { %2563 = vmatpush3.msra.mxu1 %v3124_v39  ;;  %2566 = vmatprep.mubr.msk.f32.mxu1 %vm2830_vm0, %v2829_v0 }
0x1ba6   :  { %2564 = vmatprep.subr.mxu1 %v2829_v0 }
0x1ba7   :  { %2565 = vmatpush3.msra.mxu1 %v3129_v40 }
0x1ba8   :  { %2576 = vmatprep.subr.mxu1 %v2829_v0 }
0x1c64   :  { %v1461_v58 = vpop.f32.mrf.mxu1 }
0x1c65   :  { %v1462_v31 = vadd.f32 %v3152_v44, %v1461_v58 }
0x1c66   :  { %v2554_v32 = vpop.f32.mrf.mxu1 }
0x1c67   :  { %1473 = vrot.lane.b32.xlu1 %v1462_v31, %s2832_s8  ;;  %v1465_v25 = vadd.f32 %v1462_v31, %v2952_v62 }
0x1c69   :  { %v2336_v33 = vmul.f32 -1.442695, %v1465_v25 }
0x1c6b   :  { %2688 = vpow2.f32 %v2336_v33 }
0x1c78   :  { %v2689_v9 = vpop.eup %2688 }
0x1c79   :  { %v1469_v34 = vadd.f32 1.0, %v2689_v9 }
0x1c7b   :  { %2690 = vrcp.f32 %v1469_v34 }
0x1c88   :  { %v2691_v35 = vpop.eup %2690 }
0x1c89   :  { %v1483_v43 = vsub.f32 1.0, %v2691_v35  ;;  %v1489_v46 = vmul.f32 %v2691_v35, %v1386_v30 }
0x1cd9   :  { %v1474_v36 = vpop.permute.xlu1 %1473 }
0x1cda   :  { %v1476_v37 = vmul.f32 %v2691_v35, %v1474_v36 }
0x1cdc   :  { %1478 = vrot.lane.b32.xlu0 %v1476_v37, %s2833_s0 }
0x1d4e   :  { %v1479_v38 = vpop.permute.xlu0 %1478 }
0x1d4f   :  { %v1481_v41 = vadd.f32 %v1479_v38, %v2952_v62 }
0x1d51   :  { %2692 = vtanh.f32 %v1481_v41  ;;  %v2025_v41 = vld [vmem:[#allocation10 + $0x18] sm:$0xff] }
0x1d5e   :  { %v2693_v1 = vpop.eup %2692 }
0x1d5f   :  { %1485 = vrot.lane.b32.xlu1 %v2693_v1, %s2834_s4 }
0x1dd1   :  { %v1486_v45 = vpop.permute.xlu1 %1485 }
0x1dd2   :  { %v1488_v47 = vmul.f32 %v1486_v45, %v1483_v43 }
0x1dd4   :  { %v1490_v48 = vadd.f32 %v1489_v46, %v1488_v47 }
0x1dd6   :  { %1492 = vrot.lane.b32.xlu0 %v1490_v48, %s2834_s4 }
0x1e48   :  { %v1493_v49 = vpop.permute.xlu0 %1492 }
0x1e49   :  { %1495 = vst.msk [vmem:[#allocation3 + $0x10] sm:$0xff] %vm1180_vm2, %v1493_v49  ;;  %2560 = vmatmul.mubr.msk.f32.vlgmr.msra.gmra.mxu0 %vm1180_vm2, %v1493_v49  ;;  %v2024_v49 = vld [vmem:[#allocation10 + $0x8] sm:$0xff] }
0x1e4a   :  { %2570 = vmatpush3.msra.mxu0 %v3124_v39  ;;  %2573 = vmatprep.mubr.msk.f32.mxu0 %vm2830_vm0, %v2829_v0 }
0x1e4b   :  { %2571 = vmatprep.subr.mxu0 %v2829_v0 }
0x1e4c   :  { %2572 = vmatpush3.msra.mxu0 %v3129_v40 }
0x1e4d   :  { %2583 = vmatprep.subr.mxu0 %v2829_v0 }
0x1f09   :  { %v1565_v62 = vpop.f32.mrf.mxu0 }
0x1f0a   :  { %v1566_v50 = vadd.f32 %v3152_v44, %v1565_v62  ;;  %v2017_v62 = vld [vmem:[#allocation3 + $0x8] sm:$0xff] }
0x1f0b   :  { %v2561_v13 = vpop.f32.mrf.mxu0 }
0x1f0c   :  { %1577 = vrot.lane.b32.xlu1 %v1566_v50, %s2832_s8  ;;  %v1569_v15 = vadd.f32 %v1566_v50, %v2956_v3  ;;  %v2018_v50 = vld [vmem:[#allocation3 + $0x10] sm:$0xff] }
0x1f0e   :  { %v2338_v51 = vmul.f32 -1.442695, %v1569_v15 }
0x1f10   :  { %2694 = vpow2.f32 %v2338_v51 }
0x1f1d   :  { %v2695_v52 = vpop.eup %2694 }
0x1f1e   :  { %v1573_v54 = vadd.f32 1.0, %v2695_v52 }
0x1f20   :  { %2696 = vrcp.f32 %v1573_v54 }
0x1f2d   :  { %v2697_v18 = vpop.eup %2696 }
0x1f2e   :  { %v1587_v59 = vsub.f32 1.0, %v2697_v18  ;;  %v1593_v63 = vmul.f32 %v2697_v18, %v1490_v48 }
0x1f7e   :  { %v1578_v55 = vpop.permute.xlu1 %1577 }
0x1f7f   :  { %v1580_v21 = vmul.f32 %v2697_v18, %v1578_v55 }
0x1f81   :  { %1582 = vrot.lane.b32.xlu0 %v1580_v21, %s2833_s0 }
0x1ff3   :  { %v1583_v56 = vpop.permute.xlu0 %1582 }
0x1ff4   :  { %v1585_v57 = vadd.f32 %v1583_v56, %v2956_v3 }
0x1ff6   :  { %2698 = vtanh.f32 %v1585_v57 }
0x2003   :  { %v2699_v24 = vpop.eup %2698 }
0x2004   :  { %1589 = vrot.lane.b32.xlu1 %v2699_v24, %s2834_s4 }
0x2076   :  { %v1590_v61 = vpop.permute.xlu1 %1589 }
0x2077   :  { %v1592_v53 = vmul.f32 %v1590_v61, %v1587_v59 }
0x2079   :  { %v1594_v5 = vadd.f32 %v1593_v63, %v1592_v53 }
0x207b   :  { %1596 = vrot.lane.b32.xlu0 %v1594_v5, %s2834_s4 }
0x20ed   :  { %v1597_v2 = vpop.permute.xlu0 %1596 }
0x20ee   :  { %1599 = vst.msk [vmem:[#allocation3 + $0x18] sm:$0xff] %vm1180_vm2, %v1597_v2  ;;  %2567 = vmatmul.mubr.msk.f32.vlgmr.msra.gmra.mxu1 %vm1180_vm2, %v1597_v2 }
0x20ef   :  { %2577 = vmatpush3.msra.mxu1 %v3124_v39  ;;  %2580 = vmatprep.mubr.msk.f32.mxu1 %vm2830_vm0, %v2829_v0 }
0x20f0   :  { %2578 = vmatprep.subr.mxu1 %v2829_v0 }
0x20f1   :  { %2579 = vmatpush3.msra.mxu1 %v3129_v40 }
0x20f2   :  { %2590 = vmatprep.subr.mxu1 %v2025_v41 }
0x20f5   :  { %v2019_v13 = vld [vmem:[#allocation3 + $0x18] sm:$0xff] }
0x21ae   :  { %v1669_v3 = vpop.f32.mrf.mxu1 }
0x21af   :  { %v1670_v4 = vadd.f32 %v3152_v44, %v1669_v3 }
0x21b0   :  { %v2568_v6 = vpop.f32.mrf.mxu1 }
0x21b1   :  { %1681 = vrot.lane.b32.xlu1 %v1670_v4, %s2832_s8  ;;  %v1673_v8 = vadd.f32 %v1670_v4, %v2960_v7 }
0x21b3   :  { %v2340_v10 = vmul.f32 -1.442695, %v1673_v8 }
0x21b5   :  { %2700 = vpow2.f32 %v2340_v10 }
0x21c2   :  { %v2701_v19 = vpop.eup %2700 }
0x21c3   :  { %v1677_v12 = vadd.f32 1.0, %v2701_v19 }
0x21c5   :  { %2702 = vrcp.f32 %v1677_v12 }
0x21d2   :  { %v2703_v14 = vpop.eup %2702 }
0x21d3   :  { %v1691_v28 = vsub.f32 1.0, %v2703_v14  ;;  %v1697_v30 = vmul.f32 %v2703_v14, %v1594_v5 }
0x2223   :  { %v1682_v60 = vpop.permute.xlu1 %1681 }
0x2224   :  { %v1684_v17 = vmul.f32 %v2703_v14, %v1682_v60 }
0x2226   :  { %1686 = vrot.lane.b32.xlu0 %v1684_v17, %s2833_s0 }
0x2298   :  { %v1687_v20 = vpop.permute.xlu0 %1686 }
0x2299   :  { %v1689_v23 = vadd.f32 %v1687_v20, %v2960_v7 }
0x229b   :  { %2704 = vtanh.f32 %v1689_v23 }
0x22a8   :  { %v2705_v26 = vpop.eup %2704 }
0x22a9   :  { %1693 = vrot.lane.b32.xlu1 %v2705_v26, %s2834_s4 }
0x231b   :  { %v1694_v29 = vpop.permute.xlu1 %1693 }
0x231c   :  { %v1696_v27 = vmul.f32 %v1694_v29, %v1691_v28 }
0x231e   :  { %v1698_v58 = vadd.f32 %v1697_v30, %v1696_v27  ;;  %v2835_v30 = vmov 0  }
0x231f   :  { %2626 = vset.pattern.permute.xlu1 %v2835_v30  ;;  %2627 = vset.pattern.permute.xlu0 %v2835_v30  ;;  %v2203_v30 = vld [vmem:[%s3316_s1 + $0x8] sm:$0xff] }
0x2320   :  { %1700 = vrot.lane.b32.xlu0 %v1698_v58, %s2834_s4 }
0x2392   :  { %v1701_v31 = vpop.permute.xlu0 %1700 }
0x2393   :  { %1703 = vst.msk [vmem:[#allocation3 + $0x20] sm:$0xff] %vm1180_vm2, %v1701_v31  ;;  %2574 = vmatmul.mubr.msk.f32.vlgmr.msra.gmra.mxu0 %vm1180_vm2, %v1701_v31  ;;  %v3263_v31 = vld [vmem:[%s3316_s1] sm:$0xff] }
0x2394   :  { %2584 = vmatpush3.msra.mxu0 %v3124_v39  ;;  %2587 = vmatprep.mubr.msk.f32.mxu0 %vm2830_vm0, %v2829_v0 }
0x2395   :  { %2585 = vmatprep.subr.mxu0 %v2829_v0 }
0x2396   :  { %2586 = vmatpush3.msra.mxu0 %v3129_v40 }
0x239a   :  { %v2020_v15 = vld [vmem:[#allocation3 + $0x20] sm:$0xff] }
0x2453   :  { %v1773_v7 = vpop.f32.mrf.mxu0 }
0x2454   :  { %v1774_v32 = vadd.f32 %v3152_v44, %v1773_v7 }
0x2455   :  { %v2575_v25 = vpop.f32.mrf.mxu0 }
0x2456   :  { %1785 = vrot.lane.b32.xlu1 %v1774_v32, %s2832_s8  ;;  %v1777_v33 = vadd.f32 %v1774_v32, %v2964_v11 }
0x2458   :  { %v2342_v9 = vmul.f32 -1.442695, %v1777_v33  ;;  %v2347_v33 = vld [vmem:[%s3320_s5 + $0x5] ss:$0 sm:$0xff] }
0x245a   :  { %2706 = vpow2.f32 %v2342_v9 }
0x2467   :  { %v2707_v34 = vpop.eup %2706 }
0x2468   :  { %v1781_v35 = vadd.f32 1.0, %v2707_v34  ;;  %v2162_v34 = vld [vmem:[#allocation4 + $0x8] sm:$0xff] }
0x246a   :  { %2708 = vrcp.f32 %v1781_v35 }
0x2477   :  { %v2709_v39 = vpop.eup %2708 }
0x2478   :  { %v1795_v1 = vsub.f32 1.0, %v2709_v39  ;;  %v1801_v45 = vmul.f32 %v2709_v39, %v1698_v58 }
0x24c8   :  { %v1786_v36 = vpop.permute.xlu1 %1785 }
0x24c9   :  { %v1788_v37 = vmul.f32 %v2709_v39, %v1786_v36 }
0x24cb   :  { %1790 = vrot.lane.b32.xlu0 %v1788_v37, %s2833_s0  ;;  %v2165_v37 = vld [vmem:[#allocation4 + $0x20] sm:$0xff] }
0x253d   :  { %v1791_v0 = vpop.permute.xlu0 %1790 }
0x253e   :  { %v1793_v40 = vadd.f32 %v1791_v0, %v2964_v11  ;;  %v2016_v11 = vld [vmem:[#allocation3] sm:$0xff] }
0x2540   :  { %2710 = vtanh.f32 %v1793_v40 }
0x254d   :  { %v2711_v38 = vpop.eup %2710 }
0x254e   :  { %1797 = vrot.lane.b32.xlu1 %v2711_v38, %s2834_s4 }
0x25c0   :  { %v1798_v43 = vpop.permute.xlu1 %1797 }
0x25c1   :  { %v1800_v46 = vmul.f32 %v1798_v43, %v1795_v1 }
0x25c3   :  { %v1802_v47 = vadd.f32 %v1801_v45, %v1800_v46 }
0x25c5   :  { %1804 = vrot.lane.b32.xlu0 %v1802_v47, %s2834_s4 }
0x2637   :  { %v1805_v48 = vpop.permute.xlu0 %1804 }
0x2638   :  { %1807 = vst.msk [vmem:[#allocation3 + $0x28] sm:$0xff] %vm1180_vm2, %v1805_v48  ;;  %2581 = vmatmul.mubr.msk.f32.vlgmr.msra.gmra.mxu1 %vm1180_vm2, %v1805_v48 }
0x2639   :  { %2591 = vmatpush3.msra.mxu1 %v2025_v41  ;;  %2594 = vmatprep.mubr.msk.f32.mxu1 %vm1180_vm2, %v2016_v11  ;;  %v2167_v41 = vld [vmem:[#allocation4 + $0x30] sm:$0xff] }
0x263a   :  { %2592 = vmatprep.subr.mxu1 %v2024_v49 }
0x263b   :  { %2593 = vmatpush3.msra.mxu1 %v2024_v49 }
0x263c   :  { %2595 = vmatmul.mubr.msk.f32.vlgmr.msra.gmra.mxu1 %vm1180_vm2, %v2017_v62  ;;  %v2245_v62 = vmul.f32 %v3139_v42, %v3139_v42 }
0x263d   :  { %2597 = vmatprep.mubr.msk.f32.mxu1 %vm1180_vm2, %v2018_v50 }
0x263f   :  { %v2021_v51 = vld [vmem:[#allocation3 + $0x28] sm:$0xff] }
0x2640   :  { %2598 = vmatmul.mubr.msk.f32.gmra.mxu1 %vm1180_vm2, %v2019_v13  ;;  %v2163_v13 = vld [vmem:[#allocation4 + $0x10] sm:$0xff] }
0x2641   :  { %2600 = vmatprep.mubr.msk.f32.mxu1 %vm1180_vm2, %v2020_v15 }
0x2644   :  { %2601 = vmatmul.mubr.msk.f32.gmra.mxu1 %vm1180_vm2, %v2021_v51 }
0x26f8   :  { %v1877_v52 = vpop.f32.mrf.mxu1 }
0x26f9   :  { %v1878_v54 = vadd.f32 %v3152_v44, %v1877_v52 }
0x26fa   :  { %v2582_v18 = vpop.f32.mrf.mxu1 }
0x26fb   :  { %1889 = vrot.lane.b32.xlu1 %v1878_v54, %s2832_s8  ;;  %v1881_v55 = vadd.f32 %v1878_v54, %v2968_v16  ;;  %v2164_v54 = vld [vmem:[#allocation4 + $0x18] sm:$0xff] }
0x26fc   :  { %v2596_v7 = vpop.f32.mrf.mxu1 }
0x26fd   :  { %v2344_v21 = vmul.f32 -1.442695, %v1881_v55  ;;  %v2129_v50 = vadd.f32 %v2596_v7, %v2347_v33 }
0x26fe   :  { %v2123_v32 = vpop.f32.mrf.mxu1 }
0x26ff   :  { %2712 = vpow2.f32 %v2344_v21  ;;  %v2124_v9 = vadd.f32 %v2347_v33, %v2123_v32  ;;  %v2171_v51 = vsub.f32 %v2163_v13, %v2129_v50 }
0x2700   :  { %v2599_v25 = vpop.f32.mrf.mxu1 }
0x2701   :  { %v2139_v35 = vadd.f32 %v2599_v25, %v2347_v33  ;;  %v2170_v39 = vsub.f32 %v2162_v34, %v2124_v9  ;;  %v2179_v55 = vmul.f32 %v2171_v51, %v2171_v51 }
0x2703   :  { %v2178_v40 = vmul.f32 %v2170_v39, %v2170_v39  ;;  %v2173_v38 = vsub.f32 %v2165_v37, %v2139_v35  ;;  %v2206_v39 = vld [vmem:[%s3316_s1 + $0x20] sm:$0xff] }
0x2705   :  { %v2181_v1 = vmul.f32 %v2173_v38, %v2173_v38  ;;  %v2207_v38 = vld [vmem:[%s3316_s1 + $0x28] sm:$0xff] }
0x270c   :  { %v2713_v56 = vpop.eup %2712 }
0x270d   :  { %v1885_v57 = vadd.f32 1.0, %v2713_v56  ;;  %v2166_v56 = vld [vmem:[#allocation4 + $0x28] sm:$0xff] }
0x270f   :  { %2714 = vrcp.f32 %v1885_v57 }
0x271c   :  { %v2715_v24 = vpop.eup %2714 }
0x271d   :  { %v1899_v2 = vsub.f32 1.0, %v2715_v24  ;;  %v1905_v4 = vmul.f32 %v2715_v24, %v1802_v47 }
0x276d   :  { %v1890_v59 = vpop.permute.xlu1 %1889 }
0x276e   :  { %v1892_v61 = vmul.f32 %v2715_v24, %v1890_v59 }
0x2770   :  { %1894 = vrot.lane.b32.xlu0 %v1892_v61, %s2833_s0 }
0x27e2   :  { %v1895_v63 = vpop.permute.xlu0 %1894 }
0x27e3   :  { %v1897_v53 = vadd.f32 %v1895_v63, %v2968_v16 }
0x27e5   :  { %2716 = vtanh.f32 %v1897_v53 }
0x27f2   :  { %v2717_v5 = vpop.eup %2716 }
0x27f3   :  { %1901 = vrot.lane.b32.xlu1 %v2717_v5, %s2834_s4  ;;  %v2169_v5 = vld [vmem:[#allocation4 + $0x40] sm:$0xff] }
0x2865   :  { %v1902_v3 = vpop.permute.xlu1 %1901 }
0x2866   :  { %v1904_v6 = vmul.f32 %v1902_v3, %v1899_v2 }
0x2868   :  { %v1906_v8 = vadd.f32 %v1905_v4, %v1904_v6  ;;  %v2168_v4 = vld [vmem:[#allocation4 + $0x38] sm:$0xff] }
0x286a   :  { %1908 = vrot.lane.b32.xlu0 %v1906_v8, %s2834_s4 }
0x28dc   :  { %v1909_v10 = vpop.permute.xlu0 %1908 }
0x28dd   :  { %1911 = vst.msk [vmem:[#allocation3 + $0x30] sm:$0xff] %vm1180_vm2, %v1909_v10  ;;  %2588 = vmatmul.mubr.msk.f32.vlgmr.msra.gmra.mxu0 %vm1180_vm2, %v1909_v10 }
0x28e4   :  { %v2022_v19 = vld [vmem:[#allocation3 + $0x30] sm:$0xff] }
0x28e5   :  { %2603 = vmatprep.mubr.msk.f32.mxu1 %vm1180_vm2, %v2022_v19 }
0x299d   :  { %v1981_v16 = vpop.f32.mrf.mxu0 }
0x299e   :  { %v1982_v12 = vadd.f32 %v3152_v44, %v1981_v16  ;;  %v2251_v16 = vmul.f32 1.442695, %v3139_v42 }
0x299f   :  { %v2589_v14 = vpop.f32.mrf.mxu0 }
0x29a0   :  { %1993 = vrot.lane.b32.xlu1 %v1982_v12, %s2832_s8  ;;  %v1985_v60 = vadd.f32 %v1982_v12, %v2972_v22 }
0x29a2   :  { %v2346_v17 = vmul.f32 -1.442695, %v1985_v60  ;;  %v2244_v60 = vadd.f32 1.0, %v3139_v42 }
0x29a4   :  { %2718 = vpow2.f32 %v2346_v17 }
0x29b1   :  { %v2719_v20 = vpop.eup %2718 }
0x29b2   :  { %v1989_v23 = vadd.f32 1.0, %v2719_v20 }
0x29b4   :  { %2720 = vrcp.f32 %v1989_v23 }
0x29c1   :  { %v2721_v26 = vpop.eup %2720 }
0x29c2   :  { %v2003_v46 = vsub.f32 1.0, %v2721_v26  ;;  %v2009_v48 = vmul.f32 %v2721_v26, %v1906_v8 }
0x2a12   :  { %v1994_v28 = vpop.permute.xlu1 %1993 }
0x2a13   :  { %v1996_v29 = vmul.f32 %v2721_v26, %v1994_v28 }
0x2a15   :  { %1998 = vrot.lane.b32.xlu0 %v1996_v29, %s2833_s0 }
0x2a87   :  { %v1999_v27 = vpop.permute.xlu0 %1998 }
0x2a88   :  { %v2001_v44 = vadd.f32 %v1999_v27, %v2972_v22  ;;  %v2133_v22 = vpop.f32.mrf.mxu1 }
0x2a89   :  { %v2134_v15 = vadd.f32 %v2347_v33, %v2133_v22 }
0x2a8a   :  { %2722 = vtanh.f32 %v2001_v44  ;;  %v2602_v36 = vpop.f32.mrf.mxu1  ;;  %v2204_v44 = vld [vmem:[%s3316_s1 + $0x10] sm:$0xff] }
0x2a8b   :  { %v2149_v0 = vadd.f32 %v2602_v36, %v2347_v33  ;;  %v2172_v21 = vsub.f32 %v2164_v54, %v2134_v15  ;;  %2724 = vpow2.f32 %v2251_v16 }
0x2a8c   :  { %v2143_v52 = vpop.f32.mrf.mxu1 }
0x2a8d   :  { %v2175_v43 = vsub.f32 %v2167_v41, %v2149_v0  ;;  %v2144_v18 = vadd.f32 %v2347_v33, %v2143_v52  ;;  %v2180_v57 = vmul.f32 %v2172_v21, %v2172_v21 }
0x2a8f   :  { %v2183_v45 = vmul.f32 %v2175_v43, %v2175_v43  ;;  %v2174_v24 = vsub.f32 %v2166_v56, %v2144_v18 }
0x2a91   :  { %v2182_v59 = vmul.f32 %v2174_v24, %v2174_v24 }
0x2a97   :  { %v2723_v58 = vpop.eup %2722 }
0x2a98   :  { %2005 = vrot.lane.b32.xlu1 %v2723_v58, %s2834_s4  ;;  %v2725_v20 = vpop.eup %2724 }
0x2a9c   :  { %2256 = vperm.xlu1 %2626, %v3263_v31  }
0x2ac0   :  { %2186 = vadd.xlane.f32.xlu1 %v2178_v40 }
0x2ac4   :  { %2192 = vadd.xlane.f32.xlu1 %v2181_v1 }
0x2ac8   :  { %2196 = vadd.xlane.f32.xlu1 %v2183_v45 }
0x2b0a   :  { %v2006_v47 = vpop.permute.xlu1 %2005 }
0x2b0b   :  { %v2008_v49 = vmul.f32 %v2006_v47, %v2003_v46  ;;  %v2209_v47 = vld [vmem:[%s3316_s1 + $0x38] sm:$0xff] }
0x2b0d   :  { %v2010_v11 = vadd.f32 %v2009_v48, %v2008_v49  ;;  %v2208_v49 = vld [vmem:[%s3316_s1 + $0x30] sm:$0xff] }
0x2b0f   :  { %2012 = vrot.lane.b32.xlu0 %v2010_v11, %s2834_s4 }
0x2b13   :  { %2247 = vrot.lane.b32.xlu0 %v2245_v62, %s2824_s28 }
0x2b17   :  { %v2257_v26 = vpop.permute.xlu1 %2256 }
0x2b32   :  { %2188 = vadd.xlane.f32.xlu0 %v2179_v55 }
0x2b36   :  { %2190 = vadd.xlane.f32.xlu0 %v2180_v57 }
0x2b3a   :  { %2194 = vadd.xlane.f32.xlu0 %v2182_v59 }
0x2b49   :  { %v2187_v27 = vpop.xlane.xlu1 %2186 }
0x2b4a   :  { %v2210_v42 = vmul.f32 %v3263_v31, %v2187_v27 }
0x2b4c   :  { %v2219_v22 = vsel %vm2218_vm3, %v2210_v42, 0.0 }
0x2b4d   :  { %v2193_v9 = vpop.xlane.xlu1 %2192 }
0x2b51   :  { %v2197_v41 = vpop.xlane.xlu1 %2196 }
0x2b52   :  { %v2215_v45 = vmul.f32 %v2207_v38, %v2197_v41 }
0x2b54   :  { %v2228_v62 = vsel %vm2218_vm3, %v2215_v45, 0.0 }
0x2b81   :  { %v2013_v61 = vpop.permute.xlu0 %2012 }
0x2b82   :  { %2015 = vst.msk [vmem:[#allocation3 + $0x38] sm:$0xff] %vm1180_vm2, %v2013_v61 }
0x2b85   :  { %v2248_v14 = vpop.permute.xlu0 %2247 }
0x2b86   :  { %v2250_v17 = vsub.f32 %v2244_v60, %v2248_v14 }
0x2b88   :  { %v2253_v23 = vsub.f32 %v2250_v17, %v2725_v20 }
0x2b89   :  { %v2023_v63 = vld [vmem:[#allocation3 + $0x38] sm:$0xff] }
0x2b8a   :  { %2604 = vmatmul.mubr.msk.f32.gmra.mxu1 %vm1180_vm2, %v2023_v63  ;;  %v2259_v28 = vmul.f32 %v2257_v26, %v2253_v23 }
0x2bbb   :  { %v2189_v29 = vpop.xlane.xlu0 %2188 }
0x2bbc   :  { %v2211_v7 = vmul.f32 %v2203_v30, %v2189_v29 }
0x2bbe   :  { %v2220_v25 = vsel %vm2218_vm3, %v2211_v7, 0.0 }
0x2bbf   :  { %v2191_v58 = vpop.xlane.xlu0 %2190  ;;  %v2221_v35 = vadd.f32 %v2220_v25, %v2219_v22 }
0x2bc0   :  { %v2212_v32 = vmul.f32 %v2204_v44, %v2191_v58 }
0x2bc2   :  { %v2222_v34 = vsel %vm2218_vm3, %v2212_v32, 0.0 }
0x2bc3   :  { %v2195_v36 = vpop.xlane.xlu0 %2194  ;;  %v2223_v37 = vadd.f32 %v2222_v34, %v2221_v35 }
0x2bc4   :  { %v2214_v0 = vmul.f32 %v2206_v39, %v2195_v36 }
0x2bc6   :  { %v2226_v43 = vsel %vm2218_vm3, %v2214_v0, 0.0 }
0x2c4a   :  { %v2605_v53 = vpop.f32.mrf.mxu1 }
0x2c4b   :  { %v2159_v2 = vadd.f32 %v2605_v53, %v2347_v33 }
0x2c4c   :  { %v2153_v3 = vpop.f32.mrf.mxu1 }
0x2c4d   :  { %v2154_v6 = vadd.f32 %v2347_v33, %v2153_v3  ;;  %v2177_v8 = vsub.f32 %v2169_v5, %v2159_v2  ;;  %v2205_v33 = vld [vmem:[%s3316_s1 + $0x18] sm:$0xff]  ;;  %s2786_s1 = scalar_lea.vmem %s2298_s14, 128 }
0x2c4e   :  { %v2213_v31 = vmul.f32 %v2205_v33, %v2193_v9  ;;  %p2787_p1 = scmp.ne.s32.totalorder %s2298_s14, %s2786_s1  ;;  %p2792_p3 = scmp.lt.s32.totalorder %s2786_s1, %s2786_s1 }
0x2c4f   :  { %v2185_v10 = vmul.f32 %v2177_v8, %v2177_v8  ;;  %v2176_v19 = vsub.f32 %v2168_v4, %v2154_v6 }
0x2c50   :  { %v2224_v40 = vsel %vm2218_vm3, %v2213_v31, 0.0  ;;  %p2793_p4 = por %p2792_p3, %p2791_p2 }
0x2c51   :  { %2200 = vadd.xlane.f32.xlu1 %v2185_v10  ;;  %v2184_v12 = vmul.f32 %v2176_v19, %v2176_v19  ;;  %v2225_v1 = vadd.f32 %v2224_v40, %v2223_v37 }
0x2c52   :  { %p2794_p5 = pnand %p2793_p4, %p2787_p1 }
0x2c53   :  { %2198 = vadd.xlane.f32.xlu0 %v2184_v12  ;;  %v2227_v46 = vadd.f32 %v2226_v43, %v2225_v1 }
0x2c55   :  { %v2229_v15 = vadd.f32 %v2228_v62, %v2227_v46 }
0x2c69   :  { %2261 = vrot.lane.b32.xlu0 %v2259_v28, %s2834_s4 }
0x2cda   :  { %v2201_v48 = vpop.xlane.xlu1 %2200 }
0x2cdb   :  { %v2217_v50 = vmul.f32 %v2209_v47, %v2201_v48 }
0x2cdc   :  { %v2199_v11 = vpop.xlane.xlu0 %2198 }
0x2cdd   :  { %v2216_v13 = vmul.f32 %v2208_v49, %v2199_v11  ;;  %v2232_v54 = vsel %vm2218_vm3, %v2217_v50, 0.0 }
0x2cdf   :  { %v2230_v51 = vsel %vm2218_vm3, %v2216_v13, 0.0 }
0x2ce0   :  { %v2231_v52 = vadd.f32 %v2230_v51, %v2229_v15  ;;  %v2262_v55 = vpop.permute.xlu0 %2261 }
0x2ce1   :  { %v2264_v21 = vsel %vm1180_vm2, %v2262_v55, 0.0 }
0x2ce2   :  { %v2233_v18 = vadd.f32 %v2232_v54, %v2231_v52 }
0x2ce4   :  { %2234 = vadd.xlane.f32.xlu1 %v2233_v18 }
0x2ce8   :  { %2265 = vadd.xlane.f32.xlu1 %v2264_v21 }
0x2ce9   :  { %2797 = shalt.err (!%p2794_p5)
}
0x2cea   :  { %2300 = dma.vmem_to_hbm [thread:$0]  %s2298_s14, 128, %s3322_s7, [#allocation6]  }
0x2ceb   :  { %s2837_s20 = smov [#allocation11]  }
0x2d6d   :  { %v2235_v56 = vpop.xlane.xlu1 %2234 }
0x2d6e   :  { %v2236_v57 = vrot.slane %v2235_v56, 4 }
0x2d70   :  { %v2237_v24 = vadd.f32 %v2236_v57, %v2235_v56 }
0x2d71   :  { %v2266_v59 = vpop.xlane.xlu1 %2265 }
0x2d72   :  { %v2238_v61 = vrot.slane %v2237_v24, 2  ;;  %v2267_v63 = vrot.slane %v2266_v59, 4 }
0x2d74   :  { %v2268_v53 = vadd.f32 %v2267_v63, %v2266_v59  ;;  %v2239_v5 = vadd.f32 %v2238_v61, %v2237_v24 }
0x2d76   :  { %v2269_v2 = vrot.slane %v2268_v53, 2  ;;  %v2240_v3 = vrot.slane %v2239_v5, 1 }
0x2d78   :  { %v2270_v4 = vadd.f32 %v2269_v2, %v2268_v53  ;;  %v2241_v6 = vadd.f32 %v2240_v3, %v2239_v5 }
0x2d7a   :  { %2606 = vpush %v2241_v6  ;;  %v2271_v8 = vrot.slane %v2270_v4, 1 }
0x2d7c   :  { %v2272_v10 = vadd.f32 %v2271_v8, %v2270_v4 }
0x2d7e   :  { %2608 = vpush %v2272_v10 }
0x2dab   :  { %s2607_s3 = spop %2606 }
0x2dac   :  { %s2243_s18 = smul.f32 0.001953125, %s2607_s3 }
0x2daf   :  { %s2609_s2 = spop %2608 }
0x2db0   :  { %s2274_s17 = smul.f32 0.5, %s2609_s2 }
0x2db2   :  { %s2275_s7 = smul.f32 0.015625, %s2274_s17 }
0x2db4   :  { %s2276_s0 = smul.f32 0.1, %s2275_s7 }
0x2db6   :  { %s2277_s4 = ssub.f32 %s2243_s18, %s2276_s0 }
0x2db8   :  { %s2278_s19 = smul.f32 0.4, %s2277_s4 }
0x2dba   :  { %2280 = sst [smem:[#allocation11]] %s2278_s19 }
0x2dbb   :  { %2290 = dma.smem_to_hbm %s2837_s20, 16, %s3321_s6, [#allocation7]  }
0x2dbc   :  { %2818 = dma.done.wait [#allocation7], 16  }
0x2dbd   :  { %2819 = vsyncadd [#allocation7], 4294967280 }
0x2dbe   :  { %2820 = dma.done.wait [#allocation6], 128  }
0x2dbf   :  { %2821 = vsyncadd [#allocation6], 4294967168 }
0x2dc0   :  { %2307 = sfence }
0x2dc1   :  { %2308 = vsyncpa [#allocation5], 1 }
0x2dc2   :  { %2309 = vsyncpa [#allocation9], 1 }
0x2dc3   :  { %2310 = vsyncpa [#allocation6], 1 }
0x2dc4   :  { %2311 = vsyncpa [#allocation7], 1 }

</bundles_post_ra>
